<compile_context>
chip_gen: v6e
topology: v6e:2x2x1
jax: 0.10.0
libtpu: 0.0.40
codegen_flags: <defaults>
</compile_context>

<pallas_src>
import functools
import itertools as it

import jax
import jax.numpy as jnp
import numpy as np
from jax.experimental import pallas as pl
from jax.experimental.pallas import tpu as pltpu


def comb(dim_in, num_inputs):
    return np.array(list(it.combinations(range(dim_in), num_inputs))).T  # (NI, nCr)


def atomic_kernel(x_ref, onehot_ref, o_ref, *, ni, nm_pad):
    # x_ref:      (TB, DI)           natural x layout (streamed per batch tile)
    # onehot_ref: (NI*NM_pad, DI)    coeff-scaled 0/1 selection rows (VMEM-resident)
    # o_ref:      (1, TB)            lane-dense output row (batch on lanes)
    #
    # Single MXU contraction: g_all[r, b] = sum_d onehot[r, d] * x[b, d]
    # Row block i of g_all is x[b, perm[i, m]] (block 0 additionally carries coeff[m]).
    g_all = jax.lax.dot_general(
        onehot_ref[...],
        x_ref[...],
        dimension_numbers=(((1,), (1,)), ((), ())),
        preferred_element_type=jnp.float32,
        precision=jax.lax.Precision.HIGHEST,   # f32-faithful one-hot gather
    )  # (NI*NM_pad, TB)

    # Product over num_inputs (the atomic func); static, sublane-aligned slices.
    g = g_all[0:nm_pad]
    for i in range(1, ni):
        g = g * g_all[i * nm_pad:(i + 1) * nm_pad]

    # Weighted sum over num_intermediate (coeff already folded into block 0).
    o_ref[...] = jnp.sum(g, axis=0, keepdims=True)


def atomic_function_forward(x, weight_inputs, perm_mat, *, block_b=1024):
    """x: (B, dim_in) f32; weight_inputs: (NI, NM) f32; perm_mat: (NI, NM) int (static numpy)."""
    B, DI = x.shape
    NI, NM = weight_inputs.shape
    perm_np = np.asarray(perm_mat)
    assert perm_np.shape == (NI, NM)
    assert block_b % 128 == 0

    # NM is a sublane axis -> pad to a multiple of 8, not 128.
    NM_pad = ((NM + 7) // 8) * 8

    # Clamp the batch tile to the (128-aligned) batch size; ragged last tile is
    # handled by Pallas (masked writeback), no wrapper-side pad of x needed.
    block_b_eff = min(block_b, ((B + 127) // 128) * 128)
    n_blocks = pl.cdiv(B, block_b_eff)

    # --- static setup (numpy; compile-time constants under jit) -----------------
    # onehot[i, m, d] = 1 iff d == perm[i, m]; zero rows for the NM padding.
    onehot_np = np.zeros((NI, NM_pad, DI), dtype=np.float32)
    onehot_np[np.arange(NI)[:, None], np.arange(NM)[None, :], perm_np] = 1.0

    # All weight factors hoisted out of the kernel and folded into block 0 rows.
    coeff = jnp.sum(weight_inputs, axis=0) * jnp.prod(weight_inputs, axis=0)   # (NM,)
    coeff = jnp.pad(coeff, (0, NM_pad - NM))                                    # (NM_pad,)
    onehot0 = jnp.asarray(onehot_np[0]) * coeff[:, None]                        # (NM_pad, DI)
    if NI > 1:
        rest = jnp.asarray(onehot_np[1:].reshape((NI - 1) * NM_pad, DI))
        onehot_cat = jnp.concatenate([onehot0, rest], axis=0)                   # (NI*NM_pad, DI)
    else:
        onehot_cat = onehot0

    out_row = pl.pallas_call(
        functools.partial(atomic_kernel, ni=NI, nm_pad=NM_pad),
        out_shape=jax.ShapeDtypeStruct((1, B), jnp.float32),
        grid=(n_blocks,),
        in_specs=[
            pl.BlockSpec((block_b_eff, DI), lambda i: (i, 0)),        # streamed batch tile
            pl.BlockSpec((NI * NM_pad, DI), lambda i: (0, 0)),        # constant -> VMEM-resident
        ],
        out_specs=pl.BlockSpec((1, block_b_eff), lambda i: (0, i)),   # lane-dense output
        compiler_params=pltpu.CompilerParams(
            dimension_semantics=("parallel",),
        ),
    )(x, onehot_cat)

    return out_row[0, :].reshape(B, 1)


def reference_forward(x, weight_inputs, perm_mat):
    """Pure-JAX mirror of the PyTorch forward (func = product over num_inputs)."""
    sel = x[:, perm_mat]                            # (B, NI, NM)
    weighted = weight_inputs[None] * sel            # (B, NI, NM)
    f_vals = jnp.prod(weighted, axis=1)             # (B, NM)
    # matmul(weight_inputs, outputs) -> (B, NI, 1); sum over dim=1 -> (B, 1)
    return jnp.sum(weight_inputs.sum(0)[None] * f_vals, axis=1, keepdims=True)


if __name__ == "__main__":
    # Module config: commutative=True, func = product over num_inputs
    dim_in = 8
    num_inputs = 2
    batch = 300   # deliberately not a multiple of 128 (exercises the ragged last tile)

    perm_np = comb(dim_in, num_inputs)              # (num_inputs, num_intermediate)
    num_intermediate = perm_np.shape[1]             # nCr(8, 2) = 28

    key = jax.random.PRNGKey(0)
    kx, kw_in, kw_out = jax.random.split(key, 3)

    # deterministic "torch.rand"-like init (uniform [0,1))
    x = jax.random.uniform(kx, (batch, dim_in), dtype=jnp.float32)
    weight_inputs = jax.random.uniform(
        kw_in, (num_inputs, num_intermediate), dtype=jnp.float32
    )
    # declared in __init__ but unused in forward()
    weight_outputs = jax.random.uniform(
        kw_out, (1, num_intermediate), dtype=jnp.float32
    )

    out = jax.block_until_ready(atomic_function_forward(x, weight_inputs, perm_np))
    ref = reference_forward(x, weight_inputs, jnp.asarray(perm_np, dtype=jnp.int32))

    assert out.shape == (batch, 1)
    # HIGHEST matmul precision makes the one-hot gather f32-faithful; differences
    # vs. the pure-JAX reference are only summation-order rounding.
    assert np.allclose(np.asarray(out), np.asarray(ref), rtol=1e-5, atol=1e-5)

    print("KERNEL_OK")
</pallas_src>

<mosaic_0001>
module attributes {stable_mosaic.version = 11 : i64} {
  func.func @atomic_kernel(%arg0: i32, %arg1: memref<384x8xf32, #tpu.memory_space<vmem>>, %arg2: memref<64x8xf32, #tpu.memory_space<vmem>>, %arg3: memref<1x384xf32, #tpu.memory_space<vmem>>) attributes {dimension_semantics = [#tpu.dimension_semantics<parallel>], iteration_bounds = array<i64: 1>, scalar_prefetch = 0 : i64, scratch_operands = 0 : i64, tpu.core_type = #tpu.core_type<tc>, window_params = [{transform_indices = @transform_0, window_bounds = array<i64: 384, 8>}, {pipeline_mode = #tpu.pipeline_mode<synchronous>, transform_indices = @transform_1, window_bounds = array<i64: 64, 8>}, {transform_indices = @transform_2, window_bounds = array<i64: 1, 384>}]} {
    %c0 = arith.constant 0 : index
    %c0_0 = arith.constant 0 : index
    %0 = vector.load %arg2[%c0, %c0_0] : memref<64x8xf32, #tpu.memory_space<vmem>>, vector<64x8xf32>
    %c0_1 = arith.constant 0 : index
    %c0_2 = arith.constant 0 : index
    %1 = vector.load %arg1[%c0_1, %c0_2] : memref<384x8xf32, #tpu.memory_space<vmem>>, vector<384x8xf32>
    %cst = arith.constant dense<0.000000e+00> : vector<64x384xf32>
    %2 = tpu.matmul %0, %1, %cst {dimension_numbers = #tpu.dot_dimension_numbers<[1], [1], [0], [0], [0, 0, 1, 0], [], []>, precision = #tpu.contract_precision<fp32>} : vector<64x8xf32>, vector<384x8xf32>, vector<64x384xf32> -> vector<64x384xf32>
    %3 = vector.extract_strided_slice %2 {offsets = [0, 0], sizes = [32, 384], strides = [1, 1]} : vector<64x384xf32> to vector<32x384xf32>
    %4 = vector.extract_strided_slice %2 {offsets = [32, 0], sizes = [32, 384], strides = [1, 1]} : vector<64x384xf32> to vector<32x384xf32>
    %5 = arith.mulf %3, %4 : vector<32x384xf32>
    %cst_3 = arith.constant dense<0.000000e+00> : vector<384xf32>
    %6 = vector.multi_reduction <add>, %5, %cst_3 [0] : vector<32x384xf32> to vector<384xf32>
    %7 = vector.shape_cast %6 : vector<384xf32> to vector<1x384xf32>
    %c0_4 = arith.constant 0 : index
    %c0_5 = arith.constant 0 : index
    %8 = vector.load %arg3[%c0_4, %c0_5] : memref<1x384xf32, #tpu.memory_space<vmem>>, vector<1x384xf32>
    tpu.vector_store %arg3[%c0_4, %c0_5], %7 {strides = array<i32>} : memref<1x384xf32, #tpu.memory_space<vmem>>, vector<1x384xf32>,
    return
  }
  func.func @transform_0(%arg0: i32) -> (i32, i32) {
    %c0_i32 = arith.constant 0 : i32
    %c0_i32_0 = arith.constant 0 : i32
    return %arg0, %c0_i32 : i32, i32
  }
  func.func @transform_1(%arg0: i32) -> (i32, i32) {
    %c0_i32 = arith.constant 0 : i32
    %c0_i32_0 = arith.constant 0 : i32
    %c0_i32_1 = arith.constant 0 : i32
    return %c0_i32, %c0_i32_0 : i32, i32
  }
  func.func @transform_2(%arg0: i32) -> (i32, i32) {
    %c0_i32 = arith.constant 0 : i32
    %c0_i32_0 = arith.constant 0 : i32
    return %c0_i32, %arg0 : i32, i32
  }
}

</mosaic_0001>

<bundles_post_ra>
// kernel: tpu_custom_call.1
= control target key start
LH: loop header
LB: loop body
LE: loop exit
PB: predicated region body
PF: predicated region fallthrough
CT: control target
= control target key end

     0   :  { %vm68_vm0 = vcmask 64512   ;;  %s4571_s0 = inlined_call_operand.vmem [shape: f32[300,8], index: 0, kind: input, shape index: {}]   ;;  %s4572_s1 = inlined_call_operand.vmem [shape: f32[64,8], index: 1, kind: input, shape index: {}]   ;;  %s4573_s2 = inlined_call_operand.hbm [shape: f32[1,300], index: 2, kind: output, shape index: {}]  }
   0x1   :  { %v51_v0 = vld [vmem:[%s4571_s0 + $0xf8] sm:$0xff]  ;;  %v50_v2 = vld [vmem:[%s4571_s0 + $0xf0] sm:$0xff]  ;;  %v49_v7 = vld [vmem:[%s4571_s0 + $0xe8] sm:$0xff] }
   0x2   :  { %v35_v1 = vld [vmem:[%s4571_s0 + $0x78] sm:$0xff]  ;;  %v187_v3 = vsel %vm68_vm0, %v51_v0, 0  ;;  %v184_v5 = vsel %vm68_vm0, %v50_v2, 0  ;;  %v34_v6 = vld [vmem:[%s4571_s0 + $0x70] sm:$0xff]  ;;  %v33_v8 = vld [vmem:[%s4571_s0 + $0x68] sm:$0xff]  ;;  %v181_v16 = vsel %vm68_vm0, %v49_v7, 0 }
   0x3   :  { %v139_v4 = vsel %vm68_vm0, %v35_v1, 0  ;;  %v3220_v9 = vand.u32 4294901760, %v187_v3  ;;  %v3224_v11 = vand.u32 4294901760, %v184_v5  ;;  %v136_v12 = vsel %vm68_vm0, %v34_v6, 0  ;;  %v48_v13 = vld [vmem:[%s4571_s0 + $0xe0] sm:$0xff]  ;;  %v47_v19 = vld [vmem:[%s4571_s0 + $0xd8] sm:$0xff] }
   0x4   :  { %v3222_v10 = vand.u32 4294901760, %v139_v4  ;;  %v32_v14 = vld [vmem:[%s4571_s0 + $0x60] sm:$0xff]  ;;  %v3233_v15 = vand.u32 4294901760, %v136_v12  ;;  %v133_v17 = vsel %vm68_vm0, %v33_v8, 0  ;;  %v178_v18 = vsel %vm68_vm0, %v48_v13, 0  ;;  %v31_v27 = vld [vmem:[%s4571_s0 + $0x58] sm:$0xff] }
   0x5   :  { %2462 = vmatprep.subr.mxu0 %v3220_v9  ;;  %v3242_v20 = vand.u32 4294901760, %v181_v16  ;;  %v3245_v21 = vsub.f32 %v187_v3, %v3220_v9  ;;  %v3247_v22 = vand.u32 4294901760, %v133_v17  ;;  %v3254_v24 = vsub.f32 %v184_v5, %v3224_v11  ;;  %v46_v36 = vld [vmem:[%s4571_s0 + $0xd0] sm:$0xff]  ;;  %v45_v50 = vld [vmem:[%s4571_s0 + $0xc8] sm:$0xff]  ;;  %v44_v60 = vld [vmem:[%s4571_s0 + $0xc0] sm:$0xff] }
   0x6   :  { %v3250_v23 = vsub.f32 %v139_v4, %v3222_v10  ;;  %2463 = vmatpush3.xpose.msra.mxu0 %v3222_v10  ;;  %v130_v25 = vsel %vm68_vm0, %v32_v14, 0  ;;  %v3258_v26 = vsub.f32 %v136_v12, %v3233_v15  ;;  %v3266_v30 = vand.u32 4294901760, %v178_v18  ;;  %v30_v45 = vld [vmem:[%s4571_s0 + $0x50] sm:$0xff]  ;;  %v29_v59 = vld [vmem:[%s4571_s0 + $0x48] sm:$0xff]  ;;  %v28_v5 = vld [vmem:[%s4571_s0 + $0x40] sm:$0xff] }
   0x7   :  { %2464 = vmatprep.subr.mxu0 %v3224_v11  ;;  %v4590_v28 = vand.u32 4294901760, %v3245_v21  ;;  %v175_v31 = vsel %vm68_vm0, %v47_v19, 0  ;;  %v4587_v32 = vand.u32 4294901760, %v3254_v24  ;;  %v3270_v33 = vand.u32 4294901760, %v130_v25 }
   0x8   :  { %v4589_v29 = vand.u32 4294901760, %v3250_v23  ;;  %v4586_v34 = vand.u32 4294901760, %v3258_v26  ;;  %v3274_v35 = vsub.f32 %v181_v16, %v3242_v20  ;;  %v127_v39 = vsel %vm68_vm0, %v31_v27, 0 }
   0x9   :  { %v538_v37 = vsub.f32 %v3245_v21, %v4590_v28  ;;  %v3287_v40 = vsub.f32 %v133_v17, %v3247_v22  ;;  %v545_v41 = vsub.f32 %v3254_v24, %v4587_v32  ;;  %v3296_v43 = vand.u32 4294901760, %v175_v31 }
   0xa   :  { %v426_v38 = vsub.f32 %v3250_v23, %v4589_v29  ;;  %2465 = vmatpush3.xpose.msra.mxu0 %v3233_v15  ;;  %v433_v42 = vsub.f32 %v3258_v26, %v4586_v34  ;;  %v4585_v44 = vand.u32 4294901760, %v3274_v35  ;;  %v172_v49 = vsel %vm68_vm0, %v46_v36, 0 }
   0xb   :  { %2466 = vmatprep.subr.mxu0 %v3242_v20  ;;  %v539_v46 = vand.u32 4294901760, %v538_v37  ;;  %v4583_v48 = vand.u32 4294901760, %v3287_v40  ;;  %v546_v51 = vand.u32 4294901760, %v545_v41  ;;  %v3311_v54 = vand.u32 4294901760, %v127_v39 }
   0xc   :  { %v427_v47 = vand.u32 4294901760, %v426_v38  ;;  %v434_v52 = vand.u32 4294901760, %v433_v42  ;;  %v552_v53 = vsub.f32 %v3274_v35, %v4585_v44  ;;  %v3317_v56 = vsub.f32 %v178_v18, %v3266_v30 }
   0xd   :  { %2510 = vmatprep.subr.mxu1 %v539_v46  ;;  %v440_v55 = vsub.f32 %v3287_v40, %v4583_v48  ;;  %v124_v57 = vsel %vm68_vm0, %v30_v45, 0  ;;  %v3321_v58 = vsub.f32 %v130_v25, %v3270_v33  ;;  %v3330_v62 = vand.u32 4294901760, %v172_v49 }
   0xe   :  { %2467 = vmatpush3.xpose.msra.mxu0 %v3247_v22  ;;  %2511 = vmatpush3.xpose.msra.mxu1 %v427_v47  ;;  %v553_v61 = vand.u32 4294901760, %v552_v53  ;;  %v169_v63 = vsel %vm68_vm0, %v45_v50, 0  ;;  %v3334_v0 = vsub.f32 %v175_v31, %v3296_v43  ;;  %v4582_v2 = vand.u32 4294901760, %v3317_v56 }
   0xf   :  { %2468 = vmatprep.subr.mxu0 %v3266_v30  ;;  %2512 = vmatprep.subr.mxu1 %v546_v51  ;;  %v441_v1 = vand.u32 4294901760, %v440_v55  ;;  %v3338_v3 = vand.u32 4294901760, %v124_v57  ;;  %v4580_v4 = vand.u32 4294901760, %v3321_v58  ;;  %v121_v7 = vsel %vm68_vm0, %v29_v59, 0 }
  0x10   :  { %v4578_v6 = vand.u32 4294901760, %v3334_v0  ;;  %v3347_v8 = vsub.f32 %v127_v39, %v3311_v54  ;;  %v166_v12 = vsel %vm68_vm0, %v44_v60, 0 }
  0x11   :  { %7 = vsyncpa [#allocation3], 0  ;;  %v559_v13 = vsub.f32 %v3317_v56, %v4582_v2  ;;  %v447_v14 = vsub.f32 %v3321_v58, %v4580_v4  ;;  %v3356_v16 = vand.u32 4294901760, %v169_v63  ;;  %v3358_v17 = vand.u32 4294901760, %v121_v7  ;;  %v43_v18 = vld [vmem:[%s4571_s0 + $0xb8] sm:$0xff]  ;;  %v42_v46 = vld [vmem:[%s4571_s0 + $0xb0] sm:$0xff] }
  0x12   :  { %2469 = vmatpush3.xpose.msra.mxu0 %v3270_v33  ;;  %2513 = vmatpush3.xpose.msra.mxu1 %v434_v52  ;;  %v566_v19 = vsub.f32 %v3334_v0, %v4578_v6  ;;  %v4577_v25 = vand.u32 4294901760, %v3347_v8  ;;  %v3369_v27 = vsub.f32 %v172_v49, %v3330_v62  ;;  %v118_v31 = vsel %vm68_vm0, %v28_v5, 0  ;;  %v27_v45 = vld [vmem:[%s4571_s0 + $0x38] sm:$0xff]  ;;  %v26_v59 = vld [vmem:[%s4571_s0 + $0x30] sm:$0xff]  ;;  %v41_v5 = vld [vmem:[%s4571_s0 + $0xa8] sm:$0xff] }
  0x13   :  { %2470 = vmatprep.subr.mxu0 %v3296_v43  ;;  %2514 = vmatprep.subr.mxu1 %v553_v61  ;;  %v560_v36 = vand.u32 4294901760, %v559_v13  ;;  %v3373_v37 = vand.u32 4294901760, %v166_v12  ;;  %v3376_v38 = vsub.f32 %v124_v57, %v3338_v3  ;;  %v448_v39 = vand.u32 4294901760, %v447_v14  ;;  %v23_v32 = vld [vmem:[%s4571_s0 + $0x18] sm:$0xff] }
  0x14   :  { %v4575_v41 = vand.u32 4294901760, %v3369_v27  ;;  %v163_v42 = vsel %vm68_vm0, %v43_v18, 0  ;;  %v454_v47 = vsub.f32 %v3347_v8, %v4577_v25  ;;  %v3389_v49 = vand.u32 4294901760, %v118_v31 }
  0x15   :  { %4711 = vst [vmem:[#allocation5_spill] sm:$0xff] %v3373_v37  ;;  %v4574_v50 = vand.u32 4294901760, %v3376_v38  ;;  %v3393_v51 = vsub.f32 %v169_v63, %v3356_v16  ;;  %v567_v52 = vand.u32 4294901760, %v566_v19  ;;  %v3399_v55 = vand.u32 4294901760, %v163_v42 }
  0x16   :  { %4712 = vst [vmem:[#allocation6_spill] sm:$0xff] %v3389_v49  ;;  %2471 = vmatpush3.xpose.msra.mxu0 %v3311_v54  ;;  %2515 = vmatpush3.xpose.msra.mxu1 %v441_v1  ;;  %v573_v53 = vsub.f32 %v3369_v27, %v4575_v41  ;;  %v3402_v57 = vsub.f32 %v121_v7, %v3358_v17  ;;  %v115_v61 = vsel %vm68_vm0, %v27_v45, 0  ;;  %v160_v63 = vsel %vm68_vm0, %v42_v46, 0  ;;  %v25_v46 = vld [vmem:[%s4571_s0 + $0x28] sm:$0xff] }
  0x17   :  { %4713 = vst [vmem:[#allocation7_spill] sm:$0xff] %v3399_v55  ;;  %2472 = vmatprep.subr.mxu0 %v3330_v62  ;;  %2516 = vmatprep.subr.mxu1 %v560_v36  ;;  %v4576_v60 = vand.u32 4294901760, %v3393_v51  ;;  %v3412_v1 = vsub.f32 %v166_v12, %v3373_v37  ;;  %v455_v7 = vand.u32 4294901760, %v454_v47  ;;  %v461_v13 = vsub.f32 %v3376_v38, %v4574_v50 }
  0x18   :  { %v4579_v14 = vand.u32 4294901760, %v3402_v57  ;;  %v112_v18 = vsel %vm68_vm0, %v26_v59, 0  ;;  %v574_v19 = vand.u32 4294901760, %v573_v53  ;;  %v3423_v36 = vand.u32 4294901760, %v115_v61 }
  0x19   :  { %v3425_v12 = vand.u32 4294901760, %v160_v63  ;;  %v3428_v45 = vsub.f32 %v118_v31, %v3389_v49  ;;  %v580_v47 = vsub.f32 %v3393_v51, %v4576_v60  ;;  %v157_v53 = vsel %vm68_vm0, %v41_v5, 0  ;;  %v40_v31 = vld [vmem:[%s4571_s0 + $0xa0] sm:$0xff] }
  0x1a   :  { %2473 = vmatpush3.xpose.msra.mxu0 %v3338_v3  ;;  %2517 = vmatpush3.xpose.msra.mxu1 %v448_v39  ;;  %4714 = vst [vmem:[#allocation8_spill] sm:$0xff] %v3423_v36  ;;  %v4581_v39 = vand.u32 4294901760, %v3412_v1  ;;  %v3440_v59 = vsub.f32 %v163_v42, %v3399_v55  ;;  %v3445_v50 = vand.u32 4294901760, %v112_v18  ;;  %v462_v41 = vand.u32 4294901760, %v461_v13 }
  0x1b   :  { %4715 = vst [vmem:[#allocation9_spill] sm:$0xff] %v3425_v12  ;;  %2474 = vmatprep.subr.mxu0 %v3356_v16  ;;  %2518 = vmatprep.subr.mxu1 %v567_v52  ;;  %v468_v52 = vsub.f32 %v3402_v57, %v4579_v14  ;;  %v4584_v60 = vand.u32 4294901760, %v3428_v45  ;;  %v109_v25 = vsel %vm68_vm0, %v25_v46, 0  ;;  %v3453_v42 = vand.u32 4294901760, %v157_v53 }
  0x1c   :  { %4716 = vst [vmem:[#allocation10_spill] sm:$0xff] %v3445_v50  ;;  %v3456_v5 = vsub.f32 %v115_v61, %v3423_v36  ;;  %v154_v6 = vsel %vm68_vm0, %v40_v31, 0  ;;  %v3460_v13 = vsub.f32 %v160_v63, %v3425_v12  ;;  %v581_v14 = vand.u32 4294901760, %v580_v47  ;;  %v24_v61 = vld [vmem:[%s4571_s0 + $0x20] sm:$0xff] }
  0x1d   :  { %4717 = vst [vmem:[#allocation11_spill] sm:$0xff] %v3453_v42  ;;  %v587_v46 = vsub.f32 %v3412_v1, %v4581_v39  ;;  %v3470_v4 = vand.u32 4294901760, %v109_v25  ;;  %v3473_v31 = vsub.f32 %v112_v18, %v3445_v50  ;;  %v469_v63 = vand.u32 4294901760, %v468_v52  ;;  %v39_v39 = vld [vmem:[%s4571_s0 + $0x98] sm:$0xff] }
  0x1e   :  { %2475 = vmatpush3.xpose.msra.mxu0 %v3358_v17  ;;  %2519 = vmatpush3.xpose.msra.mxu1 %v455_v7  ;;  %4718 = vst [vmem:[#allocation12_spill] sm:$0xff] %v3460_v13  ;;  %v4588_v7 = vand.u32 4294901760, %v3440_v59  ;;  %v3478_v47 = vand.u32 4294901760, %v154_v6  ;;  %v4591_v2 = vand.u32 4294901760, %v3456_v5  ;;  %v4594_v48 = vand.u32 4294901760, %v3460_v13 }
  0x1f   :  { %2476 = vmatprep.subr.mxu0 %v3373_v37  ;;  %2520 = vmatprep.subr.mxu1 %v574_v19  ;;  %4719 = vst [vmem:[#allocation13_spill] sm:$0xff] %v3470_v4  ;;  %4720 = vst [vmem:[#allocation14_spill] sm:$0xff] %v3473_v31  ;;  %v475_v19 = vsub.f32 %v3428_v45, %v4584_v60  ;;  %v106_v18 = vsel %vm68_vm0, %v24_v61, 0  ;;  %v3488_v52 = vsub.f32 %v157_v53, %v3453_v42 }
  0x20   :  { %4721 = vst [vmem:[#allocation15_spill] sm:$0xff] %v3478_v47  ;;  %v588_v60 = vand.u32 4294901760, %v587_v46  ;;  %v594_v44 = vsub.f32 %v3440_v59, %v4588_v7  ;;  %v3500_v61 = vsub.f32 %v109_v25, %v3470_v4  ;;  %v3502_v53 = vand.u32 4294901760, %v106_v18 }
  0x21   :  { %4722 = vst [vmem:[#allocation16_spill] sm:$0xff] %v3488_v52  ;;  %v3508_v46 = vsub.f32 %v154_v6, %v3478_v47  ;;  %v482_v7 = vsub.f32 %v3456_v5, %v4591_v2  ;;  %v601_v25 = vsub.f32 %v3460_v13, %v4594_v48  ;;  %v4601_v29 = vand.u32 4294901760, %v3488_v52  ;;  %v22_v48 = vld [vmem:[%s4571_s0 + $0x10] sm:$0xff] }
  0x22   :  { %2477 = vmatpush3.xpose.msra.mxu0 %v3389_v49  ;;  %2521 = vmatpush3.xpose.msra.mxu1 %v462_v41  ;;  %v151_v41 = vsel %vm68_vm0, %v39_v39, 0  ;;  %4723 = vst [vmem:[#allocation17_spill] sm:$0xff] %v3500_v61  ;;  %4724 = vst [vmem:[#allocation18_spill] sm:$0xff] %v3502_v53  ;;  %v476_v39 = vand.u32 4294901760, %v475_v19  ;;  %v595_v28 = vand.u32 4294901760, %v594_v44  ;;  %v103_v34 = vsel %vm68_vm0, %v23_v32, 0 }
  0x23   :  { %2478 = vmatprep.subr.mxu0 %v3399_v55  ;;  %2522 = vmatprep.subr.mxu1 %v581_v14  ;;  %v38_v14 = vld [vmem:[%s4571_s0 + $0x90] sm:$0xff]  ;;  %4725 = vst [vmem:[#allocation19_spill] sm:$0xff] %v3508_v46  ;;  %v3519_v6 = vand.u32 4294901760, %v151_v41  ;;  %v37_v44 = vld [vmem:[%s4571_s0 + $0x88] sm:$0xff]  ;;  %v3535_v32 = vsub.f32 %v106_v18, %v3502_v53  ;;  %v602_v2 = vand.u32 4294901760, %v601_v25  ;;  %v3544_v55 = vand.u32 4294901760, %v103_v34 }
  0x24   :  { %v21_v18 = vld [vmem:[%s4571_s0 + $0x8] sm:$0xff]  ;;  %v36_v49 = vld [vmem:[%s4571_s0 + $0x80] sm:$0xff] }
  0x25   :  { %4726 = vst [vmem:[#allocation20_spill] sm:$0xff] %v3519_v6  ;;  %4728 = vst [vmem:[#allocation21_spill] sm:$0xff] %v3535_v32 }
  0x26   :  { %2479 = vmatpush3.xpose.msra.mxu0 %v3423_v36  ;;  %2523 = vmatpush3.xpose.msra.mxu1 %v469_v63  ;;  %v4727_v63 = vand.u32 4294901760, %v3473_v31  ;;  %v148_v36 = vsel %vm68_vm0, %v38_v14, 0  ;;  %v483_v14 = vand.u32 4294901760, %v482_v7  ;;  %4729 = vst [vmem:[#allocation22_spill] sm:$0xff] %v3544_v55  ;;  %v145_v7 = vsel %vm68_vm0, %v37_v44, 0 }
  0x27   :  { %2480 = vmatprep.subr.mxu0 %v3425_v12  ;;  %2524 = vmatprep.subr.mxu1 %v588_v60  ;;  %v608_v12 = vsub.f32 %v3488_v52, %v4601_v29  ;;  %v3550_v60 = vand.u32 4294901760, %v148_v36  ;;  %v4732_v29 = vand.u32 4294901760, %v3500_v61  ;;  %v142_v44 = vsel %vm68_vm0, %v36_v49, 0 }
  0x28   :  { %v489_v19 = vsub.f32 %v3473_v31, %v4727_v63  ;;  %v12_v63 = vld [vmem:[%s4572_s1] sm:$0xff] }
  0x29   :  { %4730 = vst [vmem:[#allocation23_spill] sm:$0xff] %v3550_v60  ;;  %v496_v52 = vsub.f32 %v3500_v61, %v4732_v29  ;;  %v609_v29 = vand.u32 4294901760, %v608_v12  ;;  %v3574_v61 = vand.u32 4294901760, %v145_v7  ;;  %v3586_v12 = vsub.f32 %v148_v36, %v3550_v60 }
  0x2a   :  { %2481 = vmatpush3.xpose.msra.mxu0 %v3445_v50  ;;  %2525 = vmatpush3.xpose.msra.mxu1 %v476_v39  ;;  %v100_v50 = vsel %vm68_vm0, %v22_v48, 0  ;;  %v3555_v39 = vsub.f32 %v151_v41, %v3519_v6  ;;  %v490_v25 = vand.u32 4294901760, %v489_v19  ;;  %v97_v41 = vsel %vm68_vm0, %v21_v18, 0 }
  0x2b   :  { %2482 = vmatprep.subr.mxu0 %v3453_v42  ;;  %2526 = vmatprep.subr.mxu1 %v595_v28  ;;  %v70_v28 = vsel %vm68_vm0, %v12_v63, 0  ;;  %v4733_v42 = vand.u32 4294901760, %v3508_v46  ;;  %v3572_v19 = vand.u32 4294901760, %v100_v50  ;;  %4736 = vst [vmem:[#allocation27_spill] sm:$0xff] %v3574_v61  ;;  %v3577_v63 = vsub.f32 %v103_v34, %v3544_v55  ;;  %4738 = vst [vmem:[#allocation29_spill] sm:$0xff] %v3586_v12 }
  0x2c   :  { %4731 = vst [vmem:[#allocation24_spill] sm:$0xff] %v3555_v39  ;;  %v3569_v31 = vand.u32 4294901760, %v70_v28  ;;  %v4740_v18 = vand.u32 4294901760, %v3535_v32 }
  0x2d   :  { %v615_v48 = vsub.f32 %v3508_v46, %v4733_v42  ;;  %4735 = vst [vmem:[#allocation26_spill] sm:$0xff] %v3572_v19  ;;  %4737 = vst [vmem:[#allocation28_spill] sm:$0xff] %v3577_v63  ;;  %v13_v42 = vld [vmem:[%s4572_s1 + $0x8] sm:$0xff]  ;;  %v3594_v46 = vand.u32 4294901760, %v97_v41 }
  0x2e   :  { %4734 = vst [vmem:[#allocation25_spill] sm:$0xff] %v3569_v31  ;;  %2483 = vmatpush3.xpose.msra.mxu0 %v3470_v4  ;;  %2527 = vmatpush3.xpose.msra.mxu1 %v483_v14  ;;  %v20_v14 = vld [vmem:[%s4571_s0] sm:$0xff]  ;;  %v3592_v34 = vsub.f32 %v70_v28, %v3569_v31  ;;  %v497_v4 = vand.u32 4294901760, %v496_v52  ;;  %v503_v49 = vsub.f32 %v3535_v32, %v4740_v18  ;;  %v3606_v52 = vand.u32 4294901760, %v142_v44  ;;  %v14_v18 = vld [vmem:[%s4572_s1 + $0x10] sm:$0xff] }
  0x2f   :  { %2484 = vmatprep.subr.mxu0 %v3478_v47  ;;  %2528 = vmatprep.subr.mxu1 %v602_v2  ;;  %4739 = vst [vmem:[#allocation30_spill] sm:$0xff] %v3594_v46  ;;  %v616_v2 = vand.u32 4294901760, %v615_v48  ;;  %v73_v47 = vsel %vm68_vm0, %v13_v42, 0  ;;  %v94_v37 = vsel %vm68_vm0, %v20_v14, 0  ;;  %v3610_v48 = vsub.f32 %v100_v50, %v3572_v19 }
  0x30   :  { %2542 = vmatprep.mubr.f32.mxu1 %v3569_v31  ;;  %v3601_v36 = vand.u32 4294901760, %v3592_v34  ;;  %4741 = vst [vmem:[#allocation31_spill] sm:$0xff] %v3606_v52  ;;  %v4742_v42 = vand.u32 4294901760, %v3555_v39  ;;  %v3623_v14 = vsub.f32 %v145_v7, %v3574_v61  ;;  %v3625_v50 = vand.u32 4294901760, %v73_v47 }
  0x31   :  { %v504_v32 = vand.u32 4294901760, %v503_v49  ;;  %v3634_v28 = vand.u32 4294901760, %v94_v37  ;;  %v3638_v7 = vsub.f32 %v97_v41, %v3594_v46 }
  0x32   :  { %2485 = vmatpush3.xpose.msra.mxu0 %v3502_v53  ;;  %2529 = vmatpush3.xpose.msra.mxu1 %v490_v25  ;;  %v622_v25 = vsub.f32 %v3555_v39, %v4742_v42  ;;  %v337_v53 = vsub.f32 %v3592_v34, %v3601_v36  ;;  %4743 = vst [vmem:[#allocation32_spill] sm:$0xff] %v3623_v14  ;;  %4744 = vst [vmem:[#allocation33_spill] sm:$0xff] %v3625_v50 }
  0x33   :  { %2486 = vmatprep.subr.mxu0 %v3519_v6  ;;  %2530 = vmatprep.subr.mxu1 %v609_v29  ;;  %v76_v6 = vsel %vm68_vm0, %v14_v18, 0  ;;  %v4746_v29 = vand.u32 4294901760, %v3577_v63  ;;  %4747 = vst [vmem:[#allocation35_spill] sm:$0xff] %v3638_v7  ;;  %v3653_v41 = vsub.f32 %v73_v47, %v3625_v50  ;;  %v3667_v47 = vsub.f32 %v94_v37, %v3634_v28 }
  0x34   :  { %v3627_v13 = vand.u32 4294901760, %v337_v53  ;;  %v15_v53 = vld [vmem:[%s4572_s1 + $0x18] sm:$0xff]  ;;  %v623_v49 = vand.u32 4294901760, %v622_v25  ;;  %v3655_v39 = vand.u32 4294901760, %v76_v6 }
  0x35   :  { %v510_v42 = vsub.f32 %v3577_v63, %v4746_v29  ;;  %4750 = vst [vmem:[#allocation37_spill] sm:$0xff] %v3653_v41  ;;  %4753 = vst [vmem:[#allocation39_spill] sm:$0xff] %v3667_v47 }
  0x36   :  { %4745 = vst [vmem:[#allocation34_spill] sm:$0xff] %v3627_v13  ;;  %2487 = vmatpush3.xpose.msra.mxu0 %v3544_v55  ;;  %2531 = vmatpush3.xpose.msra.mxu1 %v497_v4  ;;  %v4748_v4 = vand.u32 4294901760, %v3586_v12  ;;  %v3649_v55 = vsub.f32 %v142_v44, %v3606_v52  ;;  %4751 = vst [vmem:[#allocation38_spill] sm:$0xff] %v3655_v39  ;;  %v4752_v44 = vand.u32 4294901760, %v3610_v48 }
  0x37   :  { %2488 = vmatprep.subr.mxu0 %v3550_v60  ;;  %2532 = vmatprep.subr.mxu1 %v616_v2  ;;  %v79_v60 = vsel %vm68_vm0, %v15_v53, 0  ;;  %v16_v2 = vld [vmem:[%s4572_s1 + $0x20] sm:$0xff]  ;;  %v511_v25 = vand.u32 4294901760, %v510_v42  ;;  %v3675_v42 = vand.u32 4294901760, %v3653_v41 }
  0x38   :  { %v629_v18 = vsub.f32 %v3586_v12, %v4748_v4  ;;  %4749 = vst [vmem:[#allocation36_spill] sm:$0xff] %v3649_v55  ;;  %2494 = vmatprep.mubr.f32.mxu0 %v3627_v13  ;;  %v517_v4 = vsub.f32 %v3610_v48, %v4752_v44  ;;  %v4754_v12 = vand.u32 4294901760, %v3623_v14  ;;  %v3678_v44 = vsub.f32 %v76_v6, %v3655_v39 }
  0x39   :  { %4755 = vst [vmem:[#allocation40_spill] sm:$0xff] %v3675_v42  ;;  %v3680_v29 = vand.u32 4294901760, %v79_v60  ;;  %v82_v37 = vsel %vm68_vm0, %v16_v2, 0  ;;  %v4758_v2 = vand.u32 4294901760, %v3649_v55 }
  0x3a   :  { %2489 = vmatpush3.xpose.msra.mxu0 %v3572_v19  ;;  %2533 = vmatpush3.xpose.msra.mxu1 %v504_v32  ;;  %v630_v53 = vand.u32 4294901760, %v629_v18  ;;  %v636_v63 = vsub.f32 %v3623_v14, %v4754_v12  ;;  %v518_v12 = vand.u32 4294901760, %v517_v4  ;;  %v4757_v18 = vand.u32 4294901760, %v3638_v7 }
  0x3b   :  { %2490 = vmatprep.subr.mxu0 %v3574_v61  ;;  %2534 = vmatprep.subr.mxu1 %v623_v49  ;;  %4756 = vst [vmem:[#allocation41_spill] sm:$0xff] %v3680_v29  ;;  %v17_v49 = vld [vmem:[%s4572_s1 + $0x28] sm:$0xff]  ;;  %v643_v19 = vsub.f32 %v3649_v55, %v4758_v2  ;;  %v3695_v14 = vand.u32 4294901760, %v82_v37  ;;  %v3700_v4 = vand.u32 4294901760, %v3678_v44  ;;  %v4760_v2 = vand.u32 4294901760, %v3667_v47 }
  0x3c   :  { %v524_v32 = vsub.f32 %v3638_v7, %v4757_v18  ;;  %v637_v6 = vand.u32 4294901760, %v636_v63  ;;  %v3703_v18 = vsub.f32 %v79_v60, %v3680_v29  ;;  %v85_v61 = vsel %vm68_vm0, %v17_v49, 0  ;;  %v18_v63 = vld [vmem:[%s4572_s1 + $0x30] sm:$0xff] }
  0x3d   :  { %4759 = vst [vmem:[#allocation42_spill] sm:$0xff] %v3695_v14  ;;  %v3714_v60 = vand.u32 4294901760, %v85_v61  ;;  %v88_v49 = vsel %vm68_vm0, %v18_v63, 0 }
  0x3e   :  { %2491 = vmatpush3.xpose.msra.mxu0 %v3594_v46  ;;  %2535 = vmatpush3.xpose.msra.mxu1 %v511_v25  ;;  %v348_v25 = vsub.f32 %v3653_v41, %v3675_v42  ;;  %v531_v42 = vsub.f32 %v3667_v47, %v4760_v2  ;;  %v359_v46 = vsub.f32 %v3678_v44, %v3700_v4 }
  0x3f   :  { %2492 = vmatprep.subr.mxu0 %v3606_v52  ;;  %2536 = vmatprep.subr.mxu1 %v630_v53  ;;  %v525_v53 = vand.u32 4294901760, %v524_v32  ;;  %v644_v52 = vand.u32 4294901760, %v643_v19  ;;  %4761 = vst [vmem:[#allocation43_spill] sm:$0xff] %v3714_v60  ;;  %v3725_v32 = vsub.f32 %v82_v37, %v3695_v14 }
  0x40   :  { %v3717_v41 = vand.u32 4294901760, %v348_v25  ;;  %v532_v19 = vand.u32 4294901760, %v531_v42  ;;  %v3733_v25 = vand.u32 4294901760, %v88_v49  ;;  %v3736_v63 = vand.u32 4294901760, %v359_v46 }
  0x41   :  { %v3744_v42 = vsub.f32 %v85_v61, %v3714_v60 }
  0x42   :  { %2493 = vmatpush3.xpose.msra.mxu0 %v3634_v28  ;;  %2537 = vmatpush3.xpose.msra.mxu1 %v518_v12  ;;  %4762 = vst [vmem:[#allocation44_spill] sm:$0xff] %v3717_v41  ;;  %v3722_v12 = vand.u32 4294901760, %v3703_v18  ;;  %4764 = vst [vmem:[#allocation46_spill] sm:$0xff] %v3733_v25  ;;  %v3752_v46 = vsub.f32 %v88_v49, %v3733_v25 }
  0x43   :  { %2538 = vmatprep.subr.mxu1 %v637_v6  ;;  %2558 = vmatprep.subr.mxu0 %v3245_v21  ;;  %v19_v6 = vld [vmem:[%s4572_s1 + $0x38] sm:$0xff]  ;;  %4765 = vst [vmem:[#allocation47_spill] sm:$0xff] %v3736_v63 }
  0x44   :  { %4763 = vst [vmem:[#allocation45_spill] sm:$0xff] %v3722_v12  ;;  %v370_v37 = vsub.f32 %v3703_v18, %v3722_v12 }
  0x45   :  { %2495 = vmatmul.mubr.f32.vlgmr.msra.gmra.mxu0 %v3627_v13 }
  0x46   :  { %2539 = vmatpush3.xpose.msra.mxu1 %v525_v53  ;;  %2559 = vmatpush3.xpose.msra.mxu0 %v3250_v23  ;;  %v3741_v53 = vand.u32 4294901760, %v3725_v32  ;;  %v3755_v2 = vand.u32 4294901760, %v370_v37  ;;  %v3777_v37 = vand.u32 4294901760, %v3752_v46 }
  0x47   :  { %2540 = vmatprep.subr.mxu1 %v644_v52  ;;  %2560 = vmatprep.subr.mxu0 %v3254_v24  ;;  %v91_v52 = vsel %vm68_vm0, %v19_v6, 0 }
  0x48   :  { %2496 = vmatprep.mubr.f32.mxu0 %v3717_v41  ;;  %4766 = vst [vmem:[#allocation48_spill] sm:$0xff] %v3741_v53  ;;  %4767 = vst [vmem:[#allocation49_spill] sm:$0xff] %v3755_v2  ;;  %v381_v61 = vsub.f32 %v3725_v32, %v3741_v53 }
  0x49   :  { %2497 = vmatmul.mubr.f32.gmra.mxu0 %v3717_v41  ;;  %v3760_v41 = vand.u32 4294901760, %v3744_v42  ;;  %4771 = vst [vmem:[#allocation53_spill] sm:$0xff] %v3777_v37 }
  0x4a   :  { %2541 = vmatpush3.xpose.msra.mxu1 %v532_v19  ;;  %2561 = vmatpush3.xpose.msra.mxu0 %v3258_v26  ;;  %v3762_v19 = vand.u32 4294901760, %v91_v52  ;;  %v3772_v49 = vand.u32 4294901760, %v381_v61 }
  0x4b   :  { %2562 = vmatprep.subr.mxu0 %v3274_v35  ;;  %2606 = vmatprep.subr.mxu1 %v3220_v9  ;;  %4768 = vst [vmem:[#allocation50_spill] sm:$0xff] %v3760_v41  ;;  %v392_v6 = vsub.f32 %v3744_v42, %v3760_v41 }
  0x4c   :  { %2498 = vmatprep.mubr.f32.mxu0 %v3736_v63  ;;  %4769 = vst [vmem:[#allocation51_spill] sm:$0xff] %v3762_v19  ;;  %4770 = vst [vmem:[#allocation52_spill] sm:$0xff] %v3772_v49 }
  0x4d   :  { %2543 = vmatmul.mubr.f32.vlgmr.msra.gmra.mxu1 %v3569_v31  ;;  %2499 = vmatmul.mubr.f32.gmra.mxu0 %v3736_v63  ;;  %v3780_v63 = vsub.f32 %v91_v52, %v3762_v19  ;;  %v3790_v61 = vand.u32 4294901760, %v392_v6  ;;  %v403_v52 = vsub.f32 %v3752_v46, %v3777_v37 }
  0x4e   :  { %2563 = vmatpush3.xpose.msra.mxu0 %v3287_v40  ;;  %2607 = vmatpush3.xpose.msra.mxu1 %v3222_v10 }
  0x4f   :  { %2564 = vmatprep.subr.mxu0 %v3317_v56  ;;  %2608 = vmatprep.subr.mxu1 %v3224_v11  ;;  %4772 = vst [vmem:[#allocation54_spill] sm:$0xff] %v3790_v61  ;;  %v3795_v13 = vand.u32 4294901760, %v3780_v63  ;;  %v3805_v6 = vand.u32 4294901760, %v403_v52 }
  0x50   :  { %2544 = vmatprep.mubr.f32.mxu1 %v3625_v50  ;;  %2500 = vmatprep.mubr.f32.mxu0 %v3755_v2 }
  0x51   :  { %2545 = vmatmul.mubr.f32.gmra.mxu1 %v3625_v50  ;;  %2501 = vmatmul.mubr.f32.gmra.mxu0 %v3755_v2  ;;  %4773 = vst [vmem:[#allocation55_spill] sm:$0xff] %v3795_v13  ;;  %4774 = vst [vmem:[#allocation56_spill] sm:$0xff] %v3805_v6  ;;  %v414_v2 = vsub.f32 %v3780_v63, %v3795_v13  ;;  %v4786_v50 = vld [vmem:[#allocation21_spill] sm:$0xff] }
  0x52   :  { %2565 = vmatpush3.xpose.msra.mxu0 %v3321_v58  ;;  %2609 = vmatpush3.xpose.msra.mxu1 %v3233_v15 }
  0x53   :  { %2566 = vmatprep.subr.mxu0 %v3334_v0  ;;  %2610 = vmatprep.subr.mxu1 %v3242_v20  ;;  %v3817_v52 = vand.u32 4294901760, %v414_v2  ;;  %v4776_v2 = vld [vmem:[#allocation12_spill] sm:$0xff] }
  0x54   :  { %2546 = vmatprep.mubr.f32.mxu1 %v3655_v39  ;;  %2502 = vmatprep.mubr.f32.mxu0 %v3772_v49 }
  0x55   :  { %2547 = vmatmul.mubr.f32.gmra.mxu1 %v3655_v39  ;;  %2503 = vmatmul.mubr.f32.gmra.mxu0 %v3772_v49  ;;  %4775 = vst [vmem:[#allocation57_spill] sm:$0xff] %v3817_v52  ;;  %v4780_v49 = vld [vmem:[#allocation16_spill] sm:$0xff]  ;;  %v4785_v39 = vld [vmem:[#allocation9_spill] sm:$0xff] }
  0x56   :  { %2567 = vmatpush3.xpose.msra.mxu0 %v3347_v8  ;;  %2611 = vmatpush3.xpose.msra.mxu1 %v3247_v22 }
  0x57   :  { %2568 = vmatprep.subr.mxu0 %v3369_v27  ;;  %2612 = vmatprep.subr.mxu1 %v3266_v30 }
  0x58   :  { %2548 = vmatprep.mubr.f32.mxu1 %v3680_v29  ;;  %2504 = vmatprep.mubr.f32.mxu0 %v3790_v61 }
  0x59   :  { %2549 = vmatmul.mubr.f32.gmra.mxu1 %v3680_v29  ;;  %2505 = vmatmul.mubr.f32.gmra.mxu0 %v3790_v61  ;;  %v4779_v61 = vld [vmem:[#allocation6_spill] sm:$0xff]  ;;  %v4784_v29 = vld [vmem:[#allocation19_spill] sm:$0xff] }
  0x5a   :  { %2569 = vmatpush3.xpose.msra.mxu0 %v3376_v38  ;;  %2613 = vmatpush3.xpose.msra.mxu1 %v3270_v33 }
  0x5b   :  { %2570 = vmatprep.subr.mxu0 %v3393_v51  ;;  %2614 = vmatprep.subr.mxu1 %v3296_v43 }
  0x5c   :  { %2550 = vmatprep.mubr.f32.mxu1 %v3695_v14  ;;  %2506 = vmatprep.mubr.f32.mxu0 %v3805_v6 }
  0x5d   :  { %2551 = vmatmul.mubr.f32.gmra.mxu1 %v3695_v14  ;;  %2507 = vmatmul.mubr.f32.gmra.mxu0 %v3805_v6  ;;  %v4778_v6 = vld [vmem:[#allocation14_spill] sm:$0xff]  ;;  %v4783_v14 = vld [vmem:[#allocation8_spill] sm:$0xff] }
  0x5e   :  { %2571 = vmatpush3.xpose.msra.mxu0 %v3402_v57  ;;  %2615 = vmatpush3.xpose.msra.mxu1 %v3311_v54 }
  0x5f   :  { %2572 = vmatprep.subr.mxu0 %v3412_v1  ;;  %2616 = vmatprep.subr.mxu1 %v3330_v62 }
  0x60   :  { %2552 = vmatprep.mubr.f32.mxu1 %v3714_v60  ;;  %2508 = vmatprep.mubr.f32.mxu0 %v3817_v52 }
  0x61   :  { %2553 = vmatmul.mubr.f32.gmra.mxu1 %v3714_v60  ;;  %2509 = vmatmul.mubr.f32.gmra.mxu0 %v3817_v52  ;;  %v4777_v52 = vld [vmem:[#allocation5_spill] sm:$0xff]  ;;  %v4781_v60 = vld [vmem:[#allocation7_spill] sm:$0xff] }
  0x62   :  { %2573 = vmatpush3.xpose.msra.mxu0 %v3428_v45  ;;  %2617 = vmatpush3.xpose.msra.mxu1 %v3338_v3 }
  0x63   :  { %2574 = vmatprep.subr.mxu0 %v3440_v59  ;;  %2618 = vmatprep.subr.mxu1 %v3356_v16 }
  0x64   :  { %2554 = vmatprep.mubr.f32.mxu1 %v3733_v25  ;;  %2590 = vmatprep.mubr.f32.mxu0 %v3592_v34 }
  0x65   :  { %2555 = vmatmul.mubr.f32.gmra.mxu1 %v3733_v25  ;;  %v4782_v25 = vld [vmem:[#allocation17_spill] sm:$0xff] }
  0x66   :  { %2575 = vmatpush3.xpose.msra.mxu0 %v3456_v5  ;;  %2619 = vmatpush3.xpose.msra.mxu1 %v3358_v17 }
  0x67   :  { %2576 = vmatprep.subr.mxu0 %v4776_v2  ;;  %2620 = vmatprep.subr.mxu1 %v4777_v52  ;;  %v4792_v52 = vld [vmem:[#allocation29_spill] sm:$0xff] }
  0x68   :  { %2556 = vmatprep.mubr.f32.mxu1 %v3762_v19 }
  0x69   :  { %2557 = vmatmul.mubr.f32.gmra.mxu1 %v3762_v19  ;;  %v4787_v19 = vld [vmem:[#allocation10_spill] sm:$0xff] }
  0x6a   :  { %2577 = vmatpush3.xpose.msra.mxu0 %v4778_v6  ;;  %2621 = vmatpush3.xpose.msra.mxu1 %v4779_v61  ;;  %v4788_v6 = vld [vmem:[#allocation24_spill] sm:$0xff]  ;;  %v4789_v61 = vld [vmem:[#allocation11_spill] sm:$0xff] }
  0x6b   :  { %2578 = vmatprep.subr.mxu0 %v4780_v49  ;;  %2622 = vmatprep.subr.mxu1 %v4781_v60  ;;  %v4790_v49 = vld [vmem:[#allocation28_spill] sm:$0xff]  ;;  %v4791_v60 = vld [vmem:[#allocation13_spill] sm:$0xff] }
  0x6c   :  { %2638 = vmatprep.mubr.f32.mxu1 %v3601_v36 }
  0x6e   :  { %2579 = vmatpush3.xpose.msra.mxu0 %v4782_v25  ;;  %2623 = vmatpush3.xpose.msra.mxu1 %v4783_v14  ;;  %v4793_v25 = vld [vmem:[#allocation15_spill] sm:$0xff] }
  0x6f   :  { %2580 = vmatprep.subr.mxu0 %v4784_v29  ;;  %2624 = vmatprep.subr.mxu1 %v4785_v39  ;;  %v4794_v29 = vld [vmem:[#allocation18_spill] sm:$0xff]  ;;  %v4795_v39 = vld [vmem:[#allocation32_spill] sm:$0xff] }
  0x72   :  { %2581 = vmatpush3.xpose.msra.mxu0 %v4786_v50  ;;  %2625 = vmatpush3.xpose.msra.mxu1 %v4787_v19  ;;  %v4796_v50 = vld [vmem:[#allocation20_spill] sm:$0xff] }
  0x73   :  { %2582 = vmatprep.subr.mxu0 %v4788_v6  ;;  %2626 = vmatprep.subr.mxu1 %v4789_v61  ;;  %v4797_v6 = vld [vmem:[#allocation22_spill] sm:$0xff] }
  0x76   :  { %2583 = vmatpush3.xpose.msra.mxu0 %v4790_v49  ;;  %2627 = vmatpush3.xpose.msra.mxu1 %v4791_v60  ;;  %v4798_v49 = vld [vmem:[#allocation23_spill] sm:$0xff] }
  0x77   :  { %2584 = vmatprep.subr.mxu0 %v4792_v52  ;;  %2628 = vmatprep.subr.mxu1 %v4793_v25  ;;  %v4799_v52 = vld [vmem:[#allocation26_spill] sm:$0xff]  ;;  %v4800_v25 = vld [vmem:[#allocation27_spill] sm:$0xff] }
  0x7a   :  { %2585 = vmatpush3.xpose.msra.mxu0 %v3610_v48  ;;  %2629 = vmatpush3.xpose.msra.mxu1 %v4794_v29  ;;  %v4801_v29 = vand.u32 4294901760, %v3245_v21  ;;  %v4807_v21 = vand.u32 4294901760, %v3258_v26  ;;  %v4811_v26 = vand.u32 4294901760, %v3317_v56  ;;  %v4824_v56 = vld [vmem:[#allocation5_spill] sm:$0xff] }
  0x7b   :  { %2586 = vmatprep.subr.mxu0 %v4795_v39  ;;  %2630 = vmatprep.subr.mxu1 %v4796_v50  ;;  %v4802_v50 = vld [vmem:[#allocation30_spill] sm:$0xff] }
  0x7e   :  { %2587 = vmatpush3.xpose.msra.mxu0 %v3638_v7  ;;  %2631 = vmatpush3.xpose.msra.mxu1 %v4797_v6  ;;  %v4803_v7 = vand.u32 4294901760, %v3250_v23  ;;  %v4804_v6 = vld [vmem:[#allocation37_spill] sm:$0xff]  ;;  %v4809_v23 = vand.u32 4294901760, %v3287_v40  ;;  %v4821_v40 = vand.u32 4294901760, %v3440_v59  ;;  %v67_v59 = vld [vmem:[%s4571_s0 + $0x178] sm:$0xff] }
  0x7f   :  { %2588 = vmatprep.subr.mxu0 %v3649_v55  ;;  %2632 = vmatprep.subr.mxu1 %v4798_v49  ;;  %v4805_v55 = vld [vmem:[#allocation31_spill] sm:$0xff] }
  0x82   :  { %2589 = vmatpush3.xpose.msra.mxu0 %v3667_v47  ;;  %2633 = vmatpush3.xpose.msra.mxu1 %v4799_v52  ;;  %v4806_v47 = vand.u32 4294901760, %v3254_v24  ;;  %v4810_v24 = vld [vmem:[#allocation40_spill] sm:$0xff] }
  0x83   :  { %2634 = vmatprep.subr.mxu1 %v4800_v25  ;;  %2654 = vmatprep.subr.mxu0 %v4801_v29  ;;  %v4808_v29 = vand.u32 4294901760, %v3274_v35  ;;  %v4820_v35 = vand.u32 4294901760, %v3428_v45 }
  0x85   :  { %2591 = vmatmul.mubr.f32.vlgmr.msra.gmra.mxu0 %v3592_v34 }
  0x86   :  { %2635 = vmatpush3.xpose.msra.mxu1 %v4802_v50  ;;  %2655 = vmatpush3.xpose.msra.mxu0 %v4803_v7 }
  0x87   :  { %2592 = vmatprep.mubr.f32.mxu0 %v4804_v6  ;;  %2636 = vmatprep.subr.mxu1 %v4805_v55 }
  0x88   :  { %2656 = vmatprep.subr.mxu0 %v4806_v47  ;;  %v4840_v47 = vld [vmem:[#allocation28_spill] sm:$0xff] }
  0x89   :  { %2593 = vmatmul.mubr.f32.gmra.mxu0 %v4804_v6 }
  0x8a   :  { %2637 = vmatpush3.xpose.msra.mxu1 %v3634_v28  ;;  %2657 = vmatpush3.xpose.msra.mxu0 %v4807_v21  ;;  %v4842_v21 = vld [vmem:[#allocation29_spill] sm:$0xff] }
  0x8b   :  { %2594 = vmatprep.mubr.f32.mxu0 %v3678_v44  ;;  %2658 = vmatprep.subr.mxu0 %v4808_v29  ;;  %v4843_v29 = vand.u32 4294901760, %v4842_v21  ;;  %v60_v21 = vld [vmem:[%s4571_s0 + $0x140] sm:$0xff] }
  0x8c   :  { %2702 = vmatprep.subr.mxu1 %v3220_v9  ;;  %v4812_v9 = vand.u32 4294901760, %v3321_v58  ;;  %v4825_v58 = vld [vmem:[#allocation14_spill] sm:$0xff] }
  0x8d   :  { %2595 = vmatmul.mubr.f32.gmra.mxu0 %v3678_v44  ;;  %2639 = vmatmul.mubr.f32.vlgmr.msra.gmra.mxu1 %v3601_v36 }
  0x8e   :  { %2659 = vmatpush3.xpose.msra.mxu0 %v4809_v23  ;;  %2703 = vmatpush3.xpose.msra.mxu1 %v3222_v10  ;;  %v4813_v10 = vand.u32 4294901760, %v3334_v0  ;;  %v4827_v0 = vld [vmem:[#allocation6_spill] sm:$0xff]  ;;  %v4844_v23 = vld [vmem:[#allocation15_spill] sm:$0xff] }
  0x8f   :  { %2596 = vmatprep.mubr.f32.mxu0 %v3703_v18  ;;  %2640 = vmatprep.mubr.f32.mxu1 %v4810_v24 }
  0x90   :  { %2660 = vmatprep.subr.mxu0 %v4811_v26  ;;  %2704 = vmatprep.subr.mxu1 %v3224_v11  ;;  %v4814_v11 = vand.u32 4294901760, %v3347_v8 }
  0x91   :  { %2597 = vmatmul.mubr.f32.gmra.mxu0 %v3703_v18  ;;  %2641 = vmatmul.mubr.f32.gmra.mxu1 %v4810_v24 }
  0x92   :  { %2661 = vmatpush3.xpose.msra.mxu0 %v4812_v9  ;;  %2705 = vmatpush3.xpose.msra.mxu1 %v3233_v15  ;;  %v4815_v15 = vand.u32 4294901760, %v3369_v27  ;;  %v4845_v9 = vand.u32 4294901760, %v3610_v48  ;;  %v64_v48 = vld [vmem:[%s4571_s0 + $0x160] sm:$0xff] }
  0x93   :  { %2598 = vmatprep.mubr.f32.mxu0 %v3725_v32  ;;  %2642 = vmatprep.mubr.f32.mxu1 %v3700_v4 }
  0x94   :  { %2662 = vmatprep.subr.mxu0 %v4813_v10  ;;  %2706 = vmatprep.subr.mxu1 %v3242_v20  ;;  %v4816_v20 = vand.u32 4294901760, %v3376_v38  ;;  %v4833_v38 = vld [vmem:[#allocation19_spill] sm:$0xff]  ;;  %v4846_v10 = vld [vmem:[#allocation18_spill] sm:$0xff] }
  0x95   :  { %2599 = vmatmul.mubr.f32.gmra.mxu0 %v3725_v32  ;;  %2643 = vmatmul.mubr.f32.gmra.mxu1 %v3700_v4 }
  0x96   :  { %2663 = vmatpush3.xpose.msra.mxu0 %v4814_v11  ;;  %2707 = vmatpush3.xpose.msra.mxu1 %v3247_v22  ;;  %v4817_v22 = vand.u32 4294901760, %v3393_v51  ;;  %v4834_v51 = vand.u32 4294901760, %v4833_v38  ;;  %v4847_v11 = vand.u32 4294901760, %v4795_v39  ;;  %v4852_v39 = vld [vmem:[#allocation36_spill] sm:$0xff] }
  0x97   :  { %2600 = vmatprep.mubr.f32.mxu0 %v3744_v42  ;;  %2644 = vmatprep.mubr.f32.mxu1 %v3722_v12 }
  0x98   :  { %2664 = vmatprep.subr.mxu0 %v4815_v15  ;;  %2708 = vmatprep.subr.mxu1 %v3266_v30  ;;  %v4818_v30 = vand.u32 4294901760, %v3402_v57  ;;  %v4835_v57 = vld [vmem:[#allocation9_spill] sm:$0xff]  ;;  %v4848_v15 = vld [vmem:[#allocation20_spill] sm:$0xff] }
  0x99   :  { %2601 = vmatmul.mubr.f32.gmra.mxu0 %v3744_v42  ;;  %2645 = vmatmul.mubr.f32.gmra.mxu1 %v3722_v12  ;;  %v4878_v12 = vld [vmem:[#allocation49_spill] sm:$0xff] }
  0x9a   :  { %2665 = vmatpush3.xpose.msra.mxu0 %v4816_v20  ;;  %2709 = vmatpush3.xpose.msra.mxu1 %v3270_v33  ;;  %v4819_v33 = vand.u32 4294901760, %v3412_v1  ;;  %v4836_v1 = vld [vmem:[#allocation21_spill] sm:$0xff] }
  0x9b   :  { %2602 = vmatprep.mubr.f32.mxu0 %v3752_v46  ;;  %2646 = vmatprep.mubr.f32.mxu1 %v3741_v53  ;;  %v4837_v45 = vand.u32 4294901760, %v4836_v1 }
  0x9c   :  { %2666 = vmatprep.subr.mxu0 %v4817_v22  ;;  %2710 = vmatprep.subr.mxu1 %v3296_v43  ;;  %v4822_v43 = vand.u32 4294901760, %v3456_v5  ;;  %v4838_v5 = vld [vmem:[#allocation24_spill] sm:$0xff] }
  0x9d   :  { %2603 = vmatmul.mubr.f32.gmra.mxu0 %v3752_v46  ;;  %2647 = vmatmul.mubr.f32.gmra.mxu1 %v3741_v53  ;;  %v4839_v7 = vand.u32 4294901760, %v4838_v5  ;;  %v4857_v5 = vld [vmem:[#allocation38_spill] sm:$0xff] }
  0x9e   :  { %2667 = vmatpush3.xpose.msra.mxu0 %v4818_v30  ;;  %2711 = vmatpush3.xpose.msra.mxu1 %v3311_v54  ;;  %v4823_v54 = vand.u32 4294901760, %v4776_v2  ;;  %v4841_v2 = vand.u32 4294901760, %v4840_v47 }
  0x9f   :  { %2604 = vmatprep.mubr.f32.mxu0 %v3780_v63  ;;  %2648 = vmatprep.mubr.f32.mxu1 %v3760_v41 }
  0xa0   :  { %2668 = vmatprep.subr.mxu0 %v4819_v33  ;;  %2712 = vmatprep.subr.mxu1 %v3330_v62  ;;  %v4826_v62 = vand.u32 4294901760, %v4825_v58  ;;  %v4849_v33 = vld [vmem:[#allocation35_spill] sm:$0xff]  ;;  %v226_v58 = vsel %vm68_vm0, %v64_v48, 0 }
  0xa1   :  { %2605 = vmatmul.mubr.f32.gmra.mxu0 %v3780_v63  ;;  %2649 = vmatmul.mubr.f32.gmra.mxu1 %v3760_v41 }
  0xa2   :  { %2669 = vmatpush3.xpose.msra.mxu0 %v4820_v35  ;;  %2713 = vmatpush3.xpose.msra.mxu1 %v3338_v3  ;;  %v4828_v3 = vld [vmem:[#allocation16_spill] sm:$0xff]  ;;  %v4850_v35 = vand.u32 4294901760, %v4849_v33 }
  0xa3   :  { %2650 = vmatprep.mubr.f32.mxu1 %v3777_v37  ;;  %2670 = vmatprep.subr.mxu0 %v4821_v40  ;;  %v4829_v8 = vand.u32 4294901760, %v4828_v3  ;;  %v4851_v40 = vld [vmem:[#allocation22_spill] sm:$0xff]  ;;  %v4854_v3 = vld [vmem:[#allocation39_spill] sm:$0xff] }
  0xa4   :  { %2714 = vmatprep.subr.mxu1 %v3356_v16  ;;  %2686 = vmatprep.mubr.f32.mxu0 %v3569_v31  ;;  %v4830_v16 = vld [vmem:[#allocation7_spill] sm:$0xff] }
  0xa5   :  { %2651 = vmatmul.mubr.f32.gmra.mxu1 %v3777_v37 }
  0xa6   :  { %2671 = vmatpush3.xpose.msra.mxu0 %v4822_v43  ;;  %2715 = vmatpush3.xpose.msra.mxu1 %v3358_v17  ;;  %v4831_v17 = vld [vmem:[#allocation17_spill] sm:$0xff]  ;;  %v4853_v43 = vand.u32 4294901760, %v4852_v39 }
  0xa7   :  { %2652 = vmatprep.mubr.f32.mxu1 %v3795_v13  ;;  %2672 = vmatprep.subr.mxu0 %v4823_v54  ;;  %v4832_v27 = vand.u32 4294901760, %v4831_v17 }
  0xa8   :  { %2716 = vmatprep.subr.mxu1 %v4824_v56 }
  0xa9   :  { %2653 = vmatmul.mubr.f32.gmra.mxu1 %v3795_v13  ;;  %v54_v13 = vld [vmem:[%s4571_s0 + $0x110] sm:$0xff] }
  0xaa   :  { %2673 = vmatpush3.xpose.msra.mxu0 %v4826_v62  ;;  %2717 = vmatpush3.xpose.msra.mxu1 %v4827_v0  ;;  %v63_v0 = vld [vmem:[%s4571_s0 + $0x158] sm:$0xff] }
  0xab   :  { %2674 = vmatprep.subr.mxu0 %v4829_v8  ;;  %2718 = vmatprep.subr.mxu1 %v4830_v16  ;;  %v4855_v8 = vand.u32 4294901760, %v4854_v3 }
  0xac   :  { %2734 = vmatprep.mubr.f32.mxu1 %v3569_v31 }
  0xae   :  { %2675 = vmatpush3.xpose.msra.mxu0 %v4832_v27  ;;  %2719 = vmatpush3.xpose.msra.mxu1 %v4783_v14  ;;  %v235_v14 = vsel %vm68_vm0, %v67_v59, 0  ;;  %v223_v27 = vsel %vm68_vm0, %v63_v0, 0  ;;  %v4862_v0 = vld [vmem:[#allocation43_spill] sm:$0xff] }
  0xaf   :  { %2676 = vmatprep.subr.mxu0 %v4834_v51  ;;  %2720 = vmatprep.subr.mxu1 %v4835_v57  ;;  %v3989_v26 = vand.u32 4294901760, %v235_v14  ;;  %v4052_v51 = vand.u32 4294901760, %v223_v27 }
  0xb1   :  { %v4004_v22 = vsub.f32 %v235_v14, %v3989_v26  ;;  %v4076_v14 = vsub.f32 %v223_v27, %v4052_v51 }
  0xb2   :  { %2677 = vmatpush3.xpose.msra.mxu0 %v4837_v45  ;;  %2721 = vmatpush3.xpose.msra.mxu1 %v4787_v19  ;;  %v66_v19 = vld [vmem:[%s4571_s0 + $0x170] sm:$0xff] }
  0xb3   :  { %2678 = vmatprep.subr.mxu0 %v4839_v7  ;;  %2722 = vmatprep.subr.mxu1 %v4789_v61  ;;  %v232_v61 = vsel %vm68_vm0, %v66_v19, 0  ;;  %v4019_v56 = vand.u32 4294901760, %v4004_v22 }
  0xb4   :  { %v4001_v20 = vand.u32 4294901760, %v232_v61 }
  0xb5   :  { %v1600_v16 = vsub.f32 %v4004_v22, %v4019_v56 }
  0xb6   :  { %2679 = vmatpush3.xpose.msra.mxu0 %v4841_v2  ;;  %2723 = vmatpush3.xpose.msra.mxu1 %v4791_v60  ;;  %v65_v60 = vld [vmem:[%s4571_s0 + $0x168] sm:$0xff]  ;;  %v4023_v62 = vsub.f32 %v232_v61, %v4001_v20  ;;  %v4094_v61 = vand.u32 4294901760, %v4076_v14 }
  0xb7   :  { %2680 = vmatprep.subr.mxu0 %v4843_v29  ;;  %2724 = vmatprep.subr.mxu1 %v4844_v23  ;;  %v229_v30 = vsel %vm68_vm0, %v65_v60, 0  ;;  %v1601_v1 = vand.u32 4294901760, %v1600_v16  ;;  %v4858_v29 = vld [vmem:[#allocation41_spill] sm:$0xff] }
  0xb8   :  { %v4016_v54 = vand.u32 4294901760, %v229_v30  ;;  %v4038_v17 = vand.u32 4294901760, %v4023_v62  ;;  %4859 = vst [vmem:[#allocation12_spill] sm:$0xff] %v4094_v61  ;;  %v1628_v33 = vsub.f32 %v4076_v14, %v4094_v61 }
  0xba   :  { %2681 = vmatpush3.xpose.msra.mxu0 %v4845_v9  ;;  %2725 = vmatpush3.xpose.msra.mxu1 %v4846_v10  ;;  %v4042_v38 = vsub.f32 %v229_v30, %v4016_v54  ;;  %v4860_v30 = vld [vmem:[#allocation42_spill] sm:$0xff]  ;;  %v1629_v3 = vand.u32 4294901760, %v1628_v33 }
  0xbb   :  { %2682 = vmatprep.subr.mxu0 %v4847_v11  ;;  %2726 = vmatprep.subr.mxu1 %v4848_v15  ;;  %v214_v11 = vsel %vm68_vm0, %v60_v21, 0  ;;  %v59_v15 = vld [vmem:[%s4571_s0 + $0x138] sm:$0xff] }
  0xbc   :  { %v4061_v45 = vand.u32 4294901760, %v4042_v38  ;;  %v211_v39 = vsel %vm68_vm0, %v59_v15, 0 }
  0xbe   :  { %2683 = vmatpush3.xpose.msra.mxu0 %v4850_v35  ;;  %2727 = vmatpush3.xpose.msra.mxu1 %v4851_v40  ;;  %v4114_v35 = vand.u32 4294901760, %v214_v11 }
  0xbf   :  { %2684 = vmatprep.subr.mxu0 %v4853_v43  ;;  %2728 = vmatprep.subr.mxu1 %v4798_v49  ;;  %v4033_v49 = vand.u32 4294901760, %v226_v58 }
  0xc1   :  { %v4055_v57 = vsub.f32 %v226_v58, %v4033_v49  ;;  %v58_v58 = vld [vmem:[%s4571_s0 + $0x130] sm:$0xff] }
  0xc2   :  { %2685 = vmatpush3.xpose.msra.mxu0 %v4855_v8  ;;  %2729 = vmatpush3.xpose.msra.mxu1 %v4799_v52  ;;  %v4856_v52 = vld [vmem:[#allocation33_spill] sm:$0xff]  ;;  %v4131_v8 = vand.u32 4294901760, %v211_v39 }
  0xc3   :  { %2730 = vmatprep.subr.mxu1 %v4800_v25  ;;  %2894 = vmatprep.subr.mxu0 %v3989_v26  ;;  %v62_v25 = vld [vmem:[%s4571_s0 + $0x150] sm:$0xff]  ;;  %v4073_v7 = vand.u32 4294901760, %v4055_v57 }
  0xc4   :  { %v220_v59 = vsel %vm68_vm0, %v62_v25, 0  ;;  %v208_v25 = vsel %vm68_vm0, %v58_v58, 0 }
  0xc5   :  { %2687 = vmatmul.mubr.f32.vlgmr.msra.gmra.mxu0 %v3569_v31  ;;  %v4080_v2 = vand.u32 4294901760, %v220_v59  ;;  %v1621_v23 = vsub.f32 %v4055_v57, %v4073_v7 }
  0xc6   :  { %2731 = vmatpush3.xpose.msra.mxu1 %v4802_v50  ;;  %2895 = vmatpush3.xpose.msra.mxu0 %v3989_v26  ;;  %v1607_v50 = vsub.f32 %v4023_v62, %v4038_v17 }
  0xc7   :  { %2688 = vmatprep.mubr.f32.mxu0 %v4856_v52  ;;  %2732 = vmatprep.subr.mxu1 %v4805_v55  ;;  %v61_v55 = vld [vmem:[%s4571_s0 + $0x148] sm:$0xff]  ;;  %v4100_v60 = vsub.f32 %v220_v59, %v4080_v2  ;;  %v1622_v48 = vand.u32 4294901760, %v1621_v23 }
  0xc8   :  { %2896 = vmatprep.subr.mxu0 %v4001_v20  ;;  %v1608_v47 = vand.u32 4294901760, %v1607_v50  ;;  %v217_v19 = vsel %vm68_vm0, %v61_v55, 0  ;;  %v57_v50 = vld [vmem:[%s4571_s0 + $0x128] sm:$0xff]  ;;  %v4151_v55 = vand.u32 4294901760, %v208_v25 }
  0xc9   :  { %2689 = vmatmul.mubr.f32.gmra.mxu0 %v4856_v52  ;;  %v4097_v10 = vand.u32 4294901760, %v217_v19  ;;  %v4117_v40 = vand.u32 4294901760, %v4100_v60  ;;  %v4864_v59 = vld [vmem:[#allocation46_spill] sm:$0xff]  ;;  %v205_v23 = vsel %vm68_vm0, %v57_v50, 0 }
  0xca   :  { %2733 = vmatpush3.xpose.msra.mxu1 %v3634_v28  ;;  %2897 = vmatpush3.xpose.msra.mxu0 %v4001_v20  ;;  %v1614_v28 = vsub.f32 %v4042_v38, %v4061_v45  ;;  %v4171_v15 = vand.u32 4294901760, %v205_v23 }
  0xcb   :  { %2690 = vmatprep.mubr.f32.mxu0 %v4857_v5  ;;  %2898 = vmatprep.subr.mxu0 %v4016_v54  ;;  %4861 = vst [vmem:[#allocation8_spill] sm:$0xff] %v4117_v40  ;;  %v4121_v43 = vsub.f32 %v217_v19, %v4097_v10  ;;  %v1635_v16 = vsub.f32 %v4100_v60, %v4117_v40  ;;  %v196_v40 = vsel %vm68_vm0, %v54_v13, 0 }
  0xcc   :  { %2938 = vmatprep.subr.mxu1 %v1601_v1  ;;  %v1615_v9 = vand.u32 4294901760, %v1614_v28  ;;  %v4232_v13 = vand.u32 4294901760, %v196_v40 }
  0xcd   :  { %2691 = vmatmul.mubr.f32.gmra.mxu0 %v4857_v5  ;;  %2735 = vmatmul.mubr.f32.vlgmr.msra.gmra.mxu1 %v3569_v31  ;;  %v4137_v27 = vand.u32 4294901760, %v4121_v43  ;;  %v1636_v28 = vand.u32 4294901760, %v1635_v16  ;;  %v55_v16 = vld [vmem:[%s4571_s0 + $0x118] sm:$0xff] }
  0xce   :  { %2899 = vmatpush3.xpose.msra.mxu0 %v4016_v54  ;;  %2939 = vmatpush3.xpose.msra.mxu1 %v1601_v1  ;;  %v4141_v1 = vsub.f32 %v214_v11, %v4114_v35  ;;  %v4866_v11 = vld [vmem:[#allocation51_spill] sm:$0xff] }
  0xcf   :  { %2692 = vmatprep.mubr.f32.mxu0 %v4858_v29  ;;  %2736 = vmatprep.mubr.f32.mxu1 %v4856_v52  ;;  %4863 = vst [vmem:[#allocation10_spill] sm:$0xff] %v4137_v27  ;;  %v1642_v19 = vsub.f32 %v4121_v43, %v4137_v27  ;;  %v199_v27 = vsel %vm68_vm0, %v55_v16, 0 }
  0xd0   :  { %2900 = vmatprep.subr.mxu0 %v4033_v49  ;;  %2940 = vmatprep.subr.mxu1 %v1608_v47  ;;  %v4160_v21 = vand.u32 4294901760, %v4141_v1  ;;  %v4215_v16 = vand.u32 4294901760, %v199_v27 }
  0xd1   :  { %2693 = vmatmul.mubr.f32.gmra.mxu0 %v4858_v29  ;;  %2737 = vmatmul.mubr.f32.gmra.mxu1 %v4856_v52  ;;  %v1643_v58 = vand.u32 4294901760, %v1642_v19 }
  0xd2   :  { %2901 = vmatpush3.xpose.msra.mxu0 %v4033_v49  ;;  %2941 = vmatpush3.xpose.msra.mxu1 %v1608_v47  ;;  %v4154_v47 = vsub.f32 %v211_v39, %v4131_v8  ;;  %4865 = vst [vmem:[#allocation11_spill] sm:$0xff] %v4160_v21  ;;  %v4178_v39 = vsub.f32 %v208_v25, %v4151_v55 }
  0xd3   :  { %2694 = vmatprep.mubr.f32.mxu0 %v4860_v30  ;;  %2738 = vmatprep.mubr.f32.mxu1 %v4857_v5  ;;  %v4235_v37 = vsub.f32 %v199_v27, %v4215_v16 }
  0xd4   :  { %2902 = vmatprep.subr.mxu0 %v4052_v51  ;;  %2942 = vmatprep.subr.mxu1 %v1615_v9  ;;  %v4196_v19 = vand.u32 4294901760, %v4178_v39 }
  0xd5   :  { %2695 = vmatmul.mubr.f32.gmra.mxu0 %v4860_v30  ;;  %2739 = vmatmul.mubr.f32.gmra.mxu1 %v4857_v5 }
  0xd6   :  { %2903 = vmatpush3.xpose.msra.mxu0 %v4052_v51  ;;  %2943 = vmatpush3.xpose.msra.mxu1 %v1615_v9  ;;  %v56_v9 = vld [vmem:[%s4571_s0 + $0x120] sm:$0xff]  ;;  %4868 = vst [vmem:[#allocation32_spill] sm:$0xff] %v4196_v19 }
  0xd7   :  { %2696 = vmatprep.mubr.f32.mxu0 %v4862_v0  ;;  %2740 = vmatprep.mubr.f32.mxu1 %v4858_v29  ;;  %v202_v33 = vsel %vm68_vm0, %v56_v9, 0  ;;  %v4199_v9 = vsub.f32 %v205_v23, %v4171_v15 }
  0xd8   :  { %2904 = vmatprep.subr.mxu0 %v4080_v2  ;;  %2944 = vmatprep.subr.mxu1 %v1622_v48  ;;  %v4189_v25 = vand.u32 4294901760, %v202_v33 }
  0xd9   :  { %2697 = vmatmul.mubr.f32.gmra.mxu0 %v4862_v0  ;;  %2741 = vmatmul.mubr.f32.gmra.mxu1 %v4858_v29 }
  0xda   :  { %2905 = vmatpush3.xpose.msra.mxu0 %v4080_v2  ;;  %2945 = vmatpush3.xpose.msra.mxu1 %v1622_v48  ;;  %v4174_v48 = vand.u32 4294901760, %v4154_v47 }
  0xdb   :  { %2698 = vmatprep.mubr.f32.mxu0 %v4864_v59  ;;  %2742 = vmatprep.mubr.f32.mxu1 %v4860_v30 }
  0xdc   :  { %2906 = vmatprep.subr.mxu0 %v4097_v10  ;;  %2946 = vmatprep.subr.mxu1 %v1629_v3  ;;  %4867 = vst [vmem:[#allocation13_spill] sm:$0xff] %v4174_v48  ;;  %v1656_v50 = vsub.f32 %v4154_v47, %v4174_v48  ;;  %v4209_v48 = vsub.f32 %v202_v33, %v4189_v25  ;;  %v53_v33 = vld [vmem:[%s4571_s0 + $0x108] sm:$0xff] }
  0xdd   :  { %2699 = vmatmul.mubr.f32.gmra.mxu0 %v4864_v59  ;;  %2743 = vmatmul.mubr.f32.gmra.mxu1 %v4860_v30  ;;  %v193_v41 = vsel %vm68_vm0, %v53_v33, 0  ;;  %v4249_v33 = vand.u32 4294901760, %v4235_v37 }
  0xde   :  { %2907 = vmatpush3.xpose.msra.mxu0 %v4097_v10  ;;  %2947 = vmatpush3.xpose.msra.mxu1 %v1629_v3  ;;  %v1649_v3 = vsub.f32 %v4141_v1, %v4160_v21  ;;  %v1657_v23 = vand.u32 4294901760, %v1656_v50  ;;  %v4246_v27 = vand.u32 4294901760, %v193_v41 }
  0xdf   :  { %2700 = vmatprep.mubr.f32.mxu0 %v4866_v11  ;;  %2744 = vmatprep.mubr.f32.mxu1 %v4862_v0  ;;  %4872 = vst [vmem:[#allocation27_spill] sm:$0xff] %v4249_v33 }
  0xe0   :  { %2908 = vmatprep.subr.mxu0 %v4114_v35  ;;  %2948 = vmatprep.subr.mxu1 %v1636_v28  ;;  %v1650_v21 = vand.u32 4294901760, %v1649_v3  ;;  %v1663_v3 = vsub.f32 %v4178_v39, %v4196_v19 }
  0xe1   :  { %2701 = vmatmul.mubr.f32.gmra.mxu0 %v4866_v11  ;;  %2745 = vmatmul.mubr.f32.gmra.mxu1 %v4862_v0 }
  0xe2   :  { %2909 = vmatpush3.xpose.msra.mxu0 %v4114_v35  ;;  %2949 = vmatpush3.xpose.msra.mxu1 %v1636_v28  ;;  %v4869_v28 = vld [vmem:[#allocation34_spill] sm:$0xff]  ;;  %v1664_v50 = vand.u32 4294901760, %v1663_v3 }
  0xe3   :  { %2746 = vmatprep.mubr.f32.mxu1 %v4864_v59  ;;  %2910 = vmatprep.subr.mxu0 %v4131_v8 }
  0xe4   :  { %2950 = vmatprep.subr.mxu1 %v1643_v58  ;;  %2926 = vmatprep.mubr.f32.mxu0 %v4869_v28  ;;  %v4218_v28 = vand.u32 4294901760, %v4199_v9 }
  0xe5   :  { %2747 = vmatmul.mubr.f32.gmra.mxu1 %v4864_v59 }
  0xe6   :  { %2911 = vmatpush3.xpose.msra.mxu0 %v4131_v8  ;;  %2951 = vmatpush3.xpose.msra.mxu1 %v1643_v58  ;;  %4870 = vst [vmem:[#allocation23_spill] sm:$0xff] %v4218_v28  ;;  %v4227_v58 = vand.u32 4294901760, %v4209_v48  ;;  %v1670_v19 = vsub.f32 %v4199_v9, %v4218_v28 }
  0xe7   :  { %2748 = vmatprep.mubr.f32.mxu1 %v4866_v11  ;;  %2912 = vmatprep.subr.mxu0 %v4151_v55 }
  0xe8   :  { %2952 = vmatprep.subr.mxu1 %v1650_v21  ;;  %4871 = vst [vmem:[#allocation26_spill] sm:$0xff] %v4227_v58  ;;  %v1677_v3 = vsub.f32 %v4209_v48, %v4227_v58  ;;  %v1671_v28 = vand.u32 4294901760, %v1670_v19  ;;  %v1684_v19 = vsub.f32 %v4235_v37, %v4249_v33 }
  0xe9   :  { %2749 = vmatmul.mubr.f32.gmra.mxu1 %v4866_v11 }
  0xea   :  { %2913 = vmatpush3.xpose.msra.mxu0 %v4151_v55  ;;  %2953 = vmatpush3.xpose.msra.mxu1 %v1650_v21  ;;  %v52_v21 = vld [vmem:[%s4571_s0 + $0x100] sm:$0xff]  ;;  %s3183_s0 = smov [#allocation2]  }
  0xeb   :  { %2914 = vmatprep.subr.mxu0 %v4171_v15  ;;  %2954 = vmatprep.subr.mxu1 %v1657_v23  ;;  %v190_v61 = vsel %vm68_vm0, %v52_v21, 0  ;;  %s2454_s7 = sshll.u32 %s3183_s0, 4  ;;  %s2455_s7 = int_to_ptr.vmem [resolvable:$true] %s2454_s7 }
  0xec   :  { %2970 = vmatprep.mubr.f32.mxu1 %v3569_v31  ;;  %v4252_v31 = vsub.f32 %v196_v40, %v4232_v13  ;;  %v4259_v58 = vand.u32 4294901760, %v190_v61  ;;  %v4265_v40 = vsub.f32 %v193_v41, %v4246_v27  ;;  %s3160_s8 = scalar_lea.vmem %s2455_s7, 48  ;;  %s3164_s9 = scalar_lea.vmem %s2455_s7, 64 }
  0xed   :  { %p3161_p0 = scmp.ne.s32.totalorder %s2455_s7, %s3160_s8  ;;  %p3165_p1 = scmp.lt.s32.totalorder %s2455_s7, %s2455_s7 }
  0xee   :  { %2915 = vmatpush3.xpose.msra.mxu0 %v4171_v15  ;;  %2955 = vmatpush3.xpose.msra.mxu1 %v1657_v23  ;;  %v1678_v23 = vand.u32 4294901760, %v1677_v3  ;;  %v4262_v53 = vand.u32 4294901760, %v4252_v31  ;;  %v4272_v3 = vand.u32 4294901760, %v4265_v40  ;;  %v4275_v33 = vsub.f32 %v190_v61, %v4259_v58  ;;  %p3166_p2 = scmp.lt.s32.totalorder %s3164_s9, %s3160_s8 }
  0xef   :  { %2916 = vmatprep.subr.mxu0 %v4189_v25  ;;  %2956 = vmatprep.subr.mxu1 %v1664_v50 }
  0xf0   :  { %4873 = vst [vmem:[#allocation30_spill] sm:$0xff] %v4262_v53  ;;  %v1691_v21 = vsub.f32 %v4252_v31, %v4262_v53  ;;  %4874 = vst [vmem:[#allocation37_spill] sm:$0xff] %v4272_v3  ;;  %p3167_p3 = por %p3166_p2, %p3165_p1 }
  0xf2   :  { %2917 = vmatpush3.xpose.msra.mxu0 %v4189_v25  ;;  %2957 = vmatpush3.xpose.msra.mxu1 %v1664_v50  ;;  %v1685_v50 = vand.u32 4294901760, %v1684_v19  ;;  %v1692_v41 = vand.u32 4294901760, %v1691_v21  ;;  %v4282_v19 = vand.u32 4294901760, %v4275_v33  ;;  %p3168_p4 = pnand %p3167_p3, %p3161_p0 }
  0xf3   :  { %2918 = vmatprep.subr.mxu0 %v4215_v16  ;;  %2958 = vmatprep.subr.mxu1 %v1671_v28 }
  0xf4   :  { %4875 = vst [vmem:[#allocation31_spill] sm:$0xff] %v4282_v19 }
  0xf6   :  { %2919 = vmatpush3.xpose.msra.mxu0 %v4215_v16  ;;  %2959 = vmatpush3.xpose.msra.mxu1 %v1671_v28  ;;  %v1698_v28 = vsub.f32 %v4265_v40, %v4272_v3  ;;  %v4876_v3 = vld [vmem:[#allocation44_spill] sm:$0xff] }
  0xf7   :  { %2920 = vmatprep.subr.mxu0 %v4232_v13  ;;  %2960 = vmatprep.subr.mxu1 %v1678_v23 }
  0xf8   :  { %v1699_v61 = vand.u32 4294901760, %v1698_v28  ;;  %v4877_v28 = vld [vmem:[#allocation47_spill] sm:$0xff] }
  0xfa   :  { %2921 = vmatpush3.xpose.msra.mxu0 %v4232_v13  ;;  %2961 = vmatpush3.xpose.msra.mxu1 %v1678_v23  ;;  %v1705_v23 = vsub.f32 %v4275_v33, %v4282_v19 }
  0xfb   :  { %2922 = vmatprep.subr.mxu0 %v4246_v27  ;;  %2962 = vmatprep.subr.mxu1 %v1685_v50 }
  0xfc   :  { %v1706_v21 = vand.u32 4294901760, %v1705_v23  ;;  %v4880_v23 = vld [vmem:[#allocation54_spill] sm:$0xff] }
  0xfe   :  { %2923 = vmatpush3.xpose.msra.mxu0 %v4246_v27  ;;  %2963 = vmatpush3.xpose.msra.mxu1 %v1685_v50 }
  0xff   :  { %2924 = vmatprep.subr.mxu0 %v4259_v58  ;;  %2964 = vmatprep.subr.mxu1 %v1692_v41 }
 0x102   :  { %2925 = vmatpush3.xpose.msra.mxu0 %v4259_v58  ;;  %2965 = vmatpush3.xpose.msra.mxu1 %v1692_v41  ;;  %v4879_v41 = vld [vmem:[#allocation52_spill] sm:$0xff] }
 0x103   :  { %2966 = vmatprep.subr.mxu1 %v1699_v61  ;;  %2982 = vmatprep.subr.mxu0 %v4004_v22 }
 0x105   :  { %2927 = vmatmul.mubr.f32.vlgmr.msra.gmra.mxu0 %v4876_v3  ;;  %v340_v53 = vpop.f32.mrf.mxu0 }
 0x106   :  { %2967 = vmatpush3.xpose.msra.mxu1 %v1699_v61  ;;  %2983 = vmatpush3.xpose.msra.mxu0 %v4004_v22 }
 0x107   :  { %2968 = vmatprep.subr.mxu1 %v1706_v21  ;;  %2984 = vmatprep.subr.mxu0 %v4023_v62  ;;  %v342_v50 = vpop.f32.mrf.mxu0 }
 0x108   :  { %2929 = vmatprep.mubr.f32.mxu0 %v4877_v28 }
 0x109   :  { %v351_v19 = vpop.f32.mrf.mxu0  ;;  %2930 = vmatmul.mubr.f32.gmra.mxu0 %v4878_v12 }
 0x10a   :  { %2969 = vmatpush3.xpose.msra.mxu1 %v1706_v21  ;;  %2985 = vmatpush3.xpose.msra.mxu0 %v4023_v62 }
 0x10b   :  { %2986 = vmatprep.subr.mxu0 %v4042_v38  ;;  %3026 = vmatprep.subr.mxu1 %v3989_v26  ;;  %v353_v3 = vpop.f32.mrf.mxu0 }
 0x10c   :  { %2932 = vmatprep.mubr.f32.mxu0 %v4879_v41  ;;  %v4881_v41 = vld [vmem:[#allocation56_spill] sm:$0xff] }
 0x10d   :  { %v649_v22 = vpop.f32.mrf.mxu1  ;;  %2971 = vmatmul.mubr.f32.vlgmr.msra.gmra.mxu1 %v4856_v52  ;;  %v362_v61 = vpop.f32.mrf.mxu0  ;;  %2933 = vmatmul.mubr.f32.gmra.mxu0 %v4880_v23 }
 0x10e   :  { %v4301_v28 = vadd.f32 %v649_v22, %v340_v53  ;;  %2987 = vmatpush3.xpose.msra.mxu0 %v4042_v38  ;;  %3027 = vmatpush3.xpose.msra.mxu1 %v3989_v26  ;;  %v4882_v53 = vld [vmem:[#allocation57_spill] sm:$0xff] }
 0x10f   :  { %v651_v12 = vpop.f32.mrf.mxu1  ;;  %2988 = vmatprep.subr.mxu0 %v4055_v57  ;;  %3028 = vmatprep.subr.mxu1 %v4001_v20  ;;  %v364_v62 = vpop.f32.mrf.mxu0 }
 0x110   :  { %v4307_v21 = vadd.f32 %v651_v12, %v342_v50  ;;  %2973 = vmatprep.mubr.f32.mxu1 %v4857_v5  ;;  %2935 = vmatprep.mubr.f32.mxu0 %v4881_v41 }
 0x111   :  { %v656_v52 = vpop.f32.mrf.mxu1  ;;  %v373_v23 = vpop.f32.mrf.mxu0  ;;  %2974 = vmatmul.mubr.f32.gmra.mxu1 %v4858_v29  ;;  %2936 = vmatmul.mubr.f32.gmra.mxu0 %v4882_v53 }
 0x112   :  { %2989 = vmatpush3.xpose.msra.mxu0 %v4055_v57  ;;  %3029 = vmatpush3.xpose.msra.mxu1 %v4001_v20  ;;  %v4315_v38 = vadd.f32 %v656_v52, %v351_v19 }
 0x113   :  { %2990 = vmatprep.subr.mxu0 %v4076_v14  ;;  %3030 = vmatprep.subr.mxu1 %v4016_v54  ;;  %v658_v50 = vpop.f32.mrf.mxu1  ;;  %v375_v22 = vpop.f32.mrf.mxu0 }
 0x114   :  { %v4319_v12 = vadd.f32 %v658_v50, %v353_v3  ;;  %2976 = vmatprep.mubr.f32.mxu1 %v4860_v30  ;;  %3014 = vmatprep.mubr.f32.mxu0 %v3592_v34 }
 0x115   :  { %v663_v41 = vpop.f32.mrf.mxu1  ;;  %v384_v53 = vpop.f32.mrf.mxu0  ;;  %2977 = vmatmul.mubr.f32.gmra.mxu1 %v4862_v0 }
 0x116   :  { %2991 = vmatpush3.xpose.msra.mxu0 %v4076_v14  ;;  %3031 = vmatpush3.xpose.msra.mxu1 %v4016_v54  ;;  %v4326_v52 = vadd.f32 %v663_v41, %v362_v61 }
 0x117   :  { %2992 = vmatprep.subr.mxu0 %v4100_v60  ;;  %3032 = vmatprep.subr.mxu1 %v4033_v49  ;;  %v665_v57 = vpop.f32.mrf.mxu1  ;;  %v386_v19 = vpop.f32.mrf.mxu0 }
 0x118   :  { %v4330_v3 = vadd.f32 %v665_v57, %v364_v62  ;;  %2979 = vmatprep.mubr.f32.mxu1 %v4864_v59 }
 0x119   :  { %v670_v34 = vpop.f32.mrf.mxu1  ;;  %v395_v50 = vpop.f32.mrf.mxu0  ;;  %2980 = vmatmul.mubr.f32.gmra.mxu1 %v4866_v11 }
 0x11a   :  { %2993 = vmatpush3.xpose.msra.mxu0 %v4100_v60  ;;  %3033 = vmatpush3.xpose.msra.mxu1 %v4033_v49  ;;  %v4336_v14 = vadd.f32 %v670_v34, %v373_v23 }
 0x11b   :  { %2994 = vmatprep.subr.mxu0 %v4121_v43  ;;  %3034 = vmatprep.subr.mxu1 %v4052_v51  ;;  %v672_v61 = vpop.f32.mrf.mxu1  ;;  %v397_v41 = vpop.f32.mrf.mxu0 }
 0x11c   :  { %v4340_v62 = vadd.f32 %v672_v61, %v375_v22  ;;  %3058 = vmatprep.mubr.f32.mxu1 %v3601_v36 }
 0x11d   :  { %v677_v57 = vpop.f32.mrf.mxu1  ;;  %v406_v34 = vpop.f32.mrf.mxu0 }
 0x11e   :  { %2995 = vmatpush3.xpose.msra.mxu0 %v4121_v43  ;;  %3035 = vmatpush3.xpose.msra.mxu1 %v4052_v51  ;;  %v4345_v60 = vadd.f32 %v677_v57, %v384_v53 }
 0x11f   :  { %2996 = vmatprep.subr.mxu0 %v4141_v1  ;;  %3036 = vmatprep.subr.mxu1 %v4080_v2  ;;  %v679_v23 = vpop.f32.mrf.mxu1  ;;  %v408_v43 = vpop.f32.mrf.mxu0 }
 0x120   :  { %v4349_v11 = vadd.f32 %v679_v23, %v386_v19 }
 0x121   :  { %v684_v59 = vpop.f32.mrf.mxu1 }
 0x122   :  { %2997 = vmatpush3.xpose.msra.mxu0 %v4141_v1  ;;  %3037 = vmatpush3.xpose.msra.mxu1 %v4080_v2  ;;  %v4353_v36 = vadd.f32 %v684_v59, %v395_v50  ;;  %v417_v1 = vpop.f32.mrf.mxu0 }
 0x123   :  { %2998 = vmatprep.subr.mxu0 %v4154_v47  ;;  %3038 = vmatprep.subr.mxu1 %v4097_v10  ;;  %v686_v22 = vpop.f32.mrf.mxu1 }
 0x124   :  { %v4357_v53 = vadd.f32 %v686_v22, %v397_v41 }
 0x125   :  { %v691_v61 = vpop.f32.mrf.mxu1 }
 0x126   :  { %2999 = vmatpush3.xpose.msra.mxu0 %v4154_v47  ;;  %3039 = vmatpush3.xpose.msra.mxu1 %v4097_v10  ;;  %v4361_v19 = vadd.f32 %v691_v61, %v406_v34  ;;  %v419_v47 = vpop.f32.mrf.mxu0 }
 0x127   :  { %3000 = vmatprep.subr.mxu0 %v4178_v39  ;;  %3040 = vmatprep.subr.mxu1 %v4114_v35  ;;  %v693_v59 = vpop.f32.mrf.mxu1 }
 0x128   :  { %v4365_v50 = vadd.f32 %v693_v59, %v408_v43 }
 0x129   :  { %v698_v57 = vpop.f32.mrf.mxu1 }
 0x12a   :  { %3001 = vmatpush3.xpose.msra.mxu0 %v4178_v39  ;;  %3041 = vmatpush3.xpose.msra.mxu1 %v4114_v35  ;;  %v4369_v41 = vadd.f32 %v698_v57, %v417_v1  ;;  %v4887_v1 = vld [vmem:[#allocation50_spill] sm:$0xff]  ;;  %v4888_v57 = vld [vmem:[#allocation53_spill] sm:$0xff] }
 0x12b   :  { %3002 = vmatprep.subr.mxu0 %v4199_v9  ;;  %3042 = vmatprep.subr.mxu1 %v4131_v8  ;;  %v700_v23 = vpop.f32.mrf.mxu1 }
 0x12c   :  { %v4373_v34 = vadd.f32 %v700_v23, %v419_v47  ;;  %v4889_v47 = vld [vmem:[#allocation8_spill] sm:$0xff] }
 0x12e   :  { %3003 = vmatpush3.xpose.msra.mxu0 %v4199_v9  ;;  %3043 = vmatpush3.xpose.msra.mxu1 %v4131_v8 }
 0x12f   :  { %3004 = vmatprep.subr.mxu0 %v4209_v48  ;;  %3044 = vmatprep.subr.mxu1 %v4151_v55 }
 0x132   :  { %3005 = vmatpush3.xpose.msra.mxu0 %v4209_v48  ;;  %3045 = vmatpush3.xpose.msra.mxu1 %v4151_v55 }
 0x133   :  { %3006 = vmatprep.subr.mxu0 %v4235_v37  ;;  %3046 = vmatprep.subr.mxu1 %v4171_v15 }
 0x136   :  { %3007 = vmatpush3.xpose.msra.mxu0 %v4235_v37  ;;  %3047 = vmatpush3.xpose.msra.mxu1 %v4171_v15 }
 0x137   :  { %3008 = vmatprep.subr.mxu0 %v4252_v31  ;;  %3048 = vmatprep.subr.mxu1 %v4189_v25 }
 0x13a   :  { %3009 = vmatpush3.xpose.msra.mxu0 %v4252_v31  ;;  %3049 = vmatpush3.xpose.msra.mxu1 %v4189_v25 }
 0x13b   :  { %3010 = vmatprep.subr.mxu0 %v4265_v40  ;;  %3050 = vmatprep.subr.mxu1 %v4215_v16 }
 0x13e   :  { %3011 = vmatpush3.xpose.msra.mxu0 %v4265_v40  ;;  %3051 = vmatpush3.xpose.msra.mxu1 %v4215_v16 }
 0x13f   :  { %3012 = vmatprep.subr.mxu0 %v4275_v33  ;;  %3052 = vmatprep.subr.mxu1 %v4232_v13 }
 0x142   :  { %3013 = vmatpush3.xpose.msra.mxu0 %v4275_v33  ;;  %3053 = vmatpush3.xpose.msra.mxu1 %v4232_v13 }
 0x143   :  { %3054 = vmatprep.subr.mxu1 %v4246_v27  ;;  %3070 = vmatprep.subr.mxu0 %v4019_v56 }
 0x145   :  { %v835_v31 = vpop.f32.mrf.mxu0  ;;  %3015 = vmatmul.mubr.f32.vlgmr.msra.gmra.mxu0 %v4804_v6 }
 0x146   :  { %v836_v37 = vadd.f32 %v835_v31, %v4301_v28  ;;  %3055 = vmatpush3.xpose.msra.mxu1 %v4246_v27  ;;  %3071 = vmatpush3.xpose.msra.mxu0 %v4019_v56 }
 0x147   :  { %v837_v48 = vpop.f32.mrf.mxu0  ;;  %3017 = vmatprep.mubr.f32.mxu0 %v3678_v44  ;;  %3056 = vmatprep.subr.mxu1 %v4259_v58 }
 0x148   :  { %v838_v39 = vadd.f32 %v837_v48, %v4307_v21  ;;  %3072 = vmatprep.subr.mxu0 %v4038_v17  ;;  %v4890_v48 = vld [vmem:[#allocation55_spill] sm:$0xff] }
 0x149   :  { %v843_v9 = vpop.f32.mrf.mxu0  ;;  %3018 = vmatmul.mubr.f32.gmra.mxu0 %v3703_v18 }
 0x14a   :  { %v844_v6 = vadd.f32 %v843_v9, %v4315_v38  ;;  %3057 = vmatpush3.xpose.msra.mxu1 %v4259_v58  ;;  %3073 = vmatpush3.xpose.msra.mxu0 %v4038_v17 }
 0x14b   :  { %v845_v33 = vpop.f32.mrf.mxu0  ;;  %3020 = vmatprep.mubr.f32.mxu0 %v3725_v32  ;;  %3074 = vmatprep.subr.mxu0 %v4061_v45 }
 0x14c   :  { %v846_v44 = vadd.f32 %v845_v33, %v4319_v12  ;;  %3114 = vmatprep.subr.mxu1 %v3989_v26  ;;  %v4891_v33 = vld [vmem:[#allocation10_spill] sm:$0xff] }
 0x14d   :  { %v851_v56 = vpop.f32.mrf.mxu0  ;;  %v997_v40 = vpop.f32.mrf.mxu1  ;;  %3021 = vmatmul.mubr.f32.gmra.mxu0 %v3744_v42  ;;  %3059 = vmatmul.mubr.f32.vlgmr.msra.gmra.mxu1 %v4810_v24 }
 0x14e   :  { %v852_v18 = vadd.f32 %v851_v56, %v4326_v52  ;;  %v4418_v28 = vadd.f32 %v997_v40, %v836_v37  ;;  %3075 = vmatpush3.xpose.msra.mxu0 %v4061_v45  ;;  %3115 = vmatpush3.xpose.msra.mxu1 %v3989_v26  ;;  %v4883_v45 = vld [vmem:[#allocation45_spill] sm:$0xff]  ;;  %v4884_v52 = vld [vmem:[#allocation48_spill] sm:$0xff] }
 0x14f   :  { %v853_v32 = vpop.f32.mrf.mxu0  ;;  %v999_v17 = vpop.f32.mrf.mxu1  ;;  %3023 = vmatprep.mubr.f32.mxu0 %v3752_v46  ;;  %3061 = vmatprep.mubr.f32.mxu1 %v3700_v4 }
 0x150   :  { %v854_v21 = vadd.f32 %v853_v32, %v4330_v3  ;;  %v4425_v38 = vadd.f32 %v999_v17, %v838_v39  ;;  %3076 = vmatprep.subr.mxu0 %v4073_v7  ;;  %3116 = vmatprep.subr.mxu1 %v4001_v20  ;;  %v4885_v3 = vld [vmem:[#allocation12_spill] sm:$0xff]  ;;  %v4892_v17 = vld [vmem:[#allocation11_spill] sm:$0xff] }
 0x151   :  { %v859_v42 = vpop.f32.mrf.mxu0  ;;  %v1006_v24 = vpop.f32.mrf.mxu1  ;;  %3024 = vmatmul.mubr.f32.gmra.mxu0 %v3780_v63  ;;  %3062 = vmatmul.mubr.f32.gmra.mxu1 %v4883_v45  ;;  %v4886_v63 = vld [vmem:[#allocation25_spill] sm:$0xff] }
 0x152   :  { %v860_v26 = vadd.f32 %v859_v42, %v4336_v14  ;;  %v4432_v12 = vadd.f32 %v1006_v24, %v844_v6  ;;  %3077 = vmatpush3.xpose.msra.mxu0 %v4073_v7  ;;  %3117 = vmatpush3.xpose.msra.mxu1 %v4001_v20 }
 0x153   :  { %v861_v4 = vpop.f32.mrf.mxu0  ;;  %v1008_v46 = vpop.f32.mrf.mxu1  ;;  %3064 = vmatprep.mubr.f32.mxu1 %v4884_v52  ;;  %3078 = vmatprep.subr.mxu0 %v4885_v3 }
 0x154   :  { %v862_v43 = vadd.f32 %v861_v4, %v4340_v62  ;;  %v4439_v22 = vadd.f32 %v1008_v46, %v846_v44  ;;  %3118 = vmatprep.subr.mxu1 %v4016_v54  ;;  %3102 = vmatprep.mubr.f32.mxu0 %v4886_v63  ;;  %v4893_v4 = vld [vmem:[#allocation13_spill] sm:$0xff] }
 0x155   :  { %v867_v14 = vpop.f32.mrf.mxu0  ;;  %v1015_v61 = vpop.f32.mrf.mxu1  ;;  %3065 = vmatmul.mubr.f32.gmra.mxu1 %v4887_v1  ;;  %v4896_v1 = vld [vmem:[#allocation26_spill] sm:$0xff] }
 0x156   :  { %v868_v20 = vadd.f32 %v867_v14, %v4345_v60  ;;  %v4445_v7 = vadd.f32 %v1015_v61, %v852_v18  ;;  %3079 = vmatpush3.xpose.msra.mxu0 %v4885_v3  ;;  %3119 = vmatpush3.xpose.msra.mxu1 %v4016_v54  ;;  %v4895_v61 = vld [vmem:[#allocation23_spill] sm:$0xff] }
 0x157   :  { %v869_v59 = vpop.f32.mrf.mxu0  ;;  %v1017_v62 = vpop.f32.mrf.mxu1  ;;  %3067 = vmatprep.mubr.f32.mxu1 %v4888_v57  ;;  %3080 = vmatprep.subr.mxu0 %v4889_v47 }
 0x158   :  { %v870_v23 = vadd.f32 %v869_v59, %v4349_v11  ;;  %v4452_v31 = vadd.f32 %v1017_v62, %v854_v21  ;;  %3120 = vmatprep.subr.mxu1 %v4033_v49 }
 0x159   :  { %v875_v37 = vpop.f32.mrf.mxu0  ;;  %v1024_v60 = vpop.f32.mrf.mxu1  ;;  %3068 = vmatmul.mubr.f32.gmra.mxu1 %v4890_v48 }
 0x15a   :  { %v876_v39 = vadd.f32 %v875_v37, %v4353_v36  ;;  %v4457_v9 = vadd.f32 %v1024_v60, %v860_v26  ;;  %3081 = vmatpush3.xpose.msra.mxu0 %v4889_v47  ;;  %3121 = vmatpush3.xpose.msra.mxu1 %v4033_v49  ;;  %v4902_v60 = vld [vmem:[#allocation46_spill] sm:$0xff] }
 0x15b   :  { %v877_v54 = vpop.f32.mrf.mxu0  ;;  %v1026_v6 = vpop.f32.mrf.mxu1  ;;  %3082 = vmatprep.subr.mxu0 %v4891_v33  ;;  %3122 = vmatprep.subr.mxu1 %v4052_v51 }
 0x15c   :  { %v878_v11 = vadd.f32 %v877_v54, %v4357_v53  ;;  %v4464_v44 = vadd.f32 %v1026_v6, %v862_v43  ;;  %3146 = vmatprep.mubr.f32.mxu1 %v4886_v63  ;;  %v4894_v43 = vld [vmem:[#allocation32_spill] sm:$0xff]  ;;  %v4903_v6 = vld [vmem:[#allocation51_spill] sm:$0xff] }
 0x15d   :  { %v883_v56 = vpop.f32.mrf.mxu0  ;;  %v1033_v36 = vpop.f32.mrf.mxu1 }
 0x15e   :  { %v884_v40 = vadd.f32 %v883_v56, %v4361_v19  ;;  %v4468_v18 = vadd.f32 %v1033_v36, %v868_v20  ;;  %3083 = vmatpush3.xpose.msra.mxu0 %v4891_v33  ;;  %3123 = vmatpush3.xpose.msra.mxu1 %v4052_v51  ;;  %v4898_v20 = vld [vmem:[#allocation30_spill] sm:$0xff] }
 0x15f   :  { %v885_v49 = vpop.f32.mrf.mxu0  ;;  %v1035_v32 = vpop.f32.mrf.mxu1  ;;  %3084 = vmatprep.subr.mxu0 %v4892_v17  ;;  %3124 = vmatprep.subr.mxu1 %v4080_v2 }
 0x160   :  { %v886_v53 = vadd.f32 %v885_v49, %v4365_v50  ;;  %v4475_v21 = vadd.f32 %v1035_v32, %v870_v23 }
 0x161   :  { %v891_v42 = vpop.f32.mrf.mxu0  ;;  %v1042_v24 = vpop.f32.mrf.mxu1 }
 0x162   :  { %v892_v19 = vadd.f32 %v891_v42, %v4369_v41  ;;  %v4478_v45 = vadd.f32 %v1042_v24, %v876_v39  ;;  %3085 = vmatpush3.xpose.msra.mxu0 %v4892_v17  ;;  %3125 = vmatpush3.xpose.msra.mxu1 %v4080_v2 }
 0x163   :  { %v893_v51 = vpop.f32.mrf.mxu0  ;;  %v1044_v26 = vpop.f32.mrf.mxu1  ;;  %3086 = vmatprep.subr.mxu0 %v4893_v4  ;;  %3126 = vmatprep.subr.mxu1 %v4097_v10 }
 0x164   :  { %v894_v50 = vadd.f32 %v893_v51, %v4373_v34  ;;  %v4485_v46 = vadd.f32 %v1044_v26, %v878_v11 }
 0x165   :  { %v1051_v52 = vpop.f32.mrf.mxu1 }
 0x166   :  { %v4487_v3 = vadd.f32 %v1051_v52, %v884_v40  ;;  %3087 = vmatpush3.xpose.msra.mxu0 %v4893_v4  ;;  %3127 = vmatpush3.xpose.msra.mxu1 %v4097_v10 }
 0x167   :  { %v1053_v41 = vpop.f32.mrf.mxu1  ;;  %3088 = vmatprep.subr.mxu0 %v4894_v43  ;;  %3128 = vmatprep.subr.mxu1 %v4114_v35 }
 0x168   :  { %v4493_v2 = vadd.f32 %v1053_v41, %v886_v53 }
 0x169   :  { %v1060_v63 = vpop.f32.mrf.mxu1 }
 0x16a   :  { %v4495_v14 = vadd.f32 %v1060_v63, %v892_v19  ;;  %3089 = vmatpush3.xpose.msra.mxu0 %v4894_v43  ;;  %3129 = vmatpush3.xpose.msra.mxu1 %v4114_v35  ;;  %v4897_v35 = vld [vmem:[#allocation27_spill] sm:$0xff] }
 0x16b   :  { %v1062_v34 = vpop.f32.mrf.mxu1  ;;  %3090 = vmatprep.subr.mxu0 %v4895_v61  ;;  %3130 = vmatprep.subr.mxu1 %v4131_v8 }
 0x16c   :  { %v4501_v10 = vadd.f32 %v1062_v34, %v894_v50 }
 0x16e   :  { %3091 = vmatpush3.xpose.msra.mxu0 %v4895_v61  ;;  %3131 = vmatpush3.xpose.msra.mxu1 %v4131_v8  ;;  %v4899_v8 = vld [vmem:[#allocation37_spill] sm:$0xff] }
 0x16f   :  { %3092 = vmatprep.subr.mxu0 %v4896_v1  ;;  %3132 = vmatprep.subr.mxu1 %v4151_v55 }
 0x172   :  { %3093 = vmatpush3.xpose.msra.mxu0 %v4896_v1  ;;  %3133 = vmatpush3.xpose.msra.mxu1 %v4151_v55  ;;  %v4900_v55 = vld [vmem:[#allocation31_spill] sm:$0xff] }
 0x173   :  { %3094 = vmatprep.subr.mxu0 %v4897_v35  ;;  %3134 = vmatprep.subr.mxu1 %v4171_v15 }
 0x176   :  { %3095 = vmatpush3.xpose.msra.mxu0 %v4897_v35  ;;  %3135 = vmatpush3.xpose.msra.mxu1 %v4171_v15 }
 0x177   :  { %3096 = vmatprep.subr.mxu0 %v4898_v20  ;;  %3136 = vmatprep.subr.mxu1 %v4189_v25 }
 0x17a   :  { %3097 = vmatpush3.xpose.msra.mxu0 %v4898_v20  ;;  %3137 = vmatpush3.xpose.msra.mxu1 %v4189_v25  ;;  %v4901_v25 = vld [vmem:[#allocation33_spill] sm:$0xff] }
 0x17b   :  { %3098 = vmatprep.subr.mxu0 %v4899_v8  ;;  %3138 = vmatprep.subr.mxu1 %v4215_v16 }
 0x17e   :  { %3099 = vmatpush3.xpose.msra.mxu0 %v4899_v8  ;;  %3139 = vmatpush3.xpose.msra.mxu1 %v4215_v16 }
 0x17f   :  { %3100 = vmatprep.subr.mxu0 %v4900_v55  ;;  %3140 = vmatprep.subr.mxu1 %v4232_v13 }
 0x182   :  { %3101 = vmatpush3.xpose.msra.mxu0 %v4900_v55  ;;  %3141 = vmatpush3.xpose.msra.mxu1 %v4232_v13 }
 0x183   :  { %3142 = vmatprep.subr.mxu1 %v4246_v27 }
 0x185   :  { %v1228_v15 = vpop.f32.mrf.mxu0  ;;  %3103 = vmatmul.mubr.f32.vlgmr.msra.gmra.mxu0 %v4901_v25 }
 0x186   :  { %v1229_v59 = vadd.f32 %v1228_v15, %v4418_v28  ;;  %3143 = vmatpush3.xpose.msra.mxu1 %v4246_v27  ;;  %3105 = vmatprep.mubr.f32.mxu0 %v4857_v5 }
 0x187   :  { %v1230_v16 = vpop.f32.mrf.mxu0  ;;  %3144 = vmatprep.subr.mxu1 %v4259_v58 }
 0x188   :  { %v1231_v62 = vadd.f32 %v1230_v16, %v4425_v38 }
 0x189   :  { %v1235_v57 = vpop.f32.mrf.mxu0  ;;  %3106 = vmatmul.mubr.f32.gmra.mxu0 %v4858_v29 }
 0x18a   :  { %v1236_v13 = vadd.f32 %v1235_v57, %v4432_v12  ;;  %3145 = vmatpush3.xpose.msra.mxu1 %v4259_v58  ;;  %3108 = vmatprep.mubr.f32.mxu0 %v4860_v30 }
 0x18b   :  { %v1237_v47 = vpop.f32.mrf.mxu0 }
 0x18c   :  { %v1238_v28 = vadd.f32 %v1237_v47, %v4439_v22 }
 0x18d   :  { %v1242_v27 = vpop.f32.mrf.mxu0  ;;  %v1381_v23 = vpop.f32.mrf.mxu1  ;;  %3109 = vmatmul.mubr.f32.gmra.mxu0 %v4862_v0  ;;  %3147 = vmatmul.mubr.f32.vlgmr.msra.gmra.mxu1 %v4901_v25 }
 0x18e   :  { %v1243_v38 = vadd.f32 %v1242_v27, %v4445_v7  ;;  %v1382_v37 = vadd.f32 %v1381_v23, %v1229_v59  ;;  %3111 = vmatprep.mubr.f32.mxu0 %v4902_v60  ;;  %3149 = vmatprep.mubr.f32.mxu1 %v4857_v5 }
 0x18f   :  { %v1244_v12 = vpop.f32.mrf.mxu0  ;;  %v1383_v58 = vpop.f32.mrf.mxu1 }
 0x190   :  { %v1245_v48 = vadd.f32 %v1244_v12, %v4452_v31  ;;  %v1384_v39 = vadd.f32 %v1383_v58, %v1231_v62 }
 0x191   :  { %v1249_v54 = vpop.f32.mrf.mxu0  ;;  %v1388_v22 = vpop.f32.mrf.mxu1  ;;  %3112 = vmatmul.mubr.f32.gmra.mxu0 %v4903_v6  ;;  %3150 = vmatmul.mubr.f32.gmra.mxu1 %v4858_v29 }
 0x192   :  { %v1250_v33 = vadd.f32 %v1249_v54, %v4457_v9  ;;  %v1389_v11 = vadd.f32 %v1388_v22, %v1236_v13  ;;  %3152 = vmatprep.mubr.f32.mxu1 %v4860_v30 }
 0x193   :  { %v1251_v7 = vpop.f32.mrf.mxu0  ;;  %v1390_v56 = vpop.f32.mrf.mxu1 }
 0x194   :  { %v1252_v5 = vadd.f32 %v1251_v7, %v4464_v44  ;;  %v1391_v36 = vadd.f32 %v1390_v56, %v1238_v28 }
 0x195   :  { %v1256_v40 = vpop.f32.mrf.mxu0  ;;  %v1395_v49 = vpop.f32.mrf.mxu1  ;;  %3153 = vmatmul.mubr.f32.gmra.mxu1 %v4862_v0 }
 0x196   :  { %v1396_v31 = vadd.f32 %v1395_v49, %v1243_v38  ;;  %3155 = vmatprep.mubr.f32.mxu1 %v4902_v60  ;;  %v1257_v44 = vadd.f32 %v1256_v40, %v4468_v18 }
 0x197   :  { %v1258_v32 = vpop.f32.mrf.mxu0  ;;  %v1397_v17 = vpop.f32.mrf.mxu1 }
 0x198   :  { %v1398_v29 = vadd.f32 %v1397_v17, %v1245_v48  ;;  %v1259_v0 = vadd.f32 %v1258_v32, %v4475_v21 }
 0x199   :  { %v1263_v53 = vpop.f32.mrf.mxu0  ;;  %v1402_v9 = vpop.f32.mrf.mxu1  ;;  %3156 = vmatmul.mubr.f32.gmra.mxu1 %v4903_v6 }
 0x19a   :  { %v1403_v30 = vadd.f32 %v1402_v9, %v1250_v33  ;;  %v1264_v41 = vadd.f32 %v1263_v53, %v4478_v45 }
 0x19b   :  { %v1265_v42 = vpop.f32.mrf.mxu0  ;;  %v1404_v24 = vpop.f32.mrf.mxu1 }
 0x19c   :  { %v1405_v19 = vadd.f32 %v1404_v24, %v1252_v5  ;;  %v1266_v61 = vadd.f32 %v1265_v42, %v4485_v46 }
 0x19d   :  { %v1270_v51 = vpop.f32.mrf.mxu0  ;;  %v1409_v26 = vpop.f32.mrf.mxu1 }
 0x19e   :  { %v1410_v4 = vadd.f32 %v1409_v26, %v1257_v44  ;;  %v1271_v18 = vadd.f32 %v1270_v51, %v4487_v3 }
 0x19f   :  { %v1272_v50 = vpop.f32.mrf.mxu0  ;;  %v1411_v52 = vpop.f32.mrf.mxu1 }
 0x1a0   :  { %v2377_v43 = vmul.f32 %v1410_v4, %v1382_v37  ;;  %v1412_v63 = vadd.f32 %v1411_v52, %v1259_v0  ;;  %v1273_v21 = vadd.f32 %v1272_v50, %v4493_v2 }
 0x1a1   :  { %v1416_v34 = vpop.f32.mrf.mxu1  ;;  %v1277_v20 = vpop.f32.mrf.mxu0 }
 0x1a2   :  { %v2378_v1 = vmul.f32 %v1412_v63, %v1384_v39  ;;  %v1417_v35 = vadd.f32 %v1416_v34, %v1264_v41  ;;  %v1278_v13 = vadd.f32 %v1277_v20, %v4495_v14 }
 0x1a3   :  { %v1418_v8 = vpop.f32.mrf.mxu1  ;;  %v1279_v45 = vpop.f32.mrf.mxu0 }
 0x1a4   :  { %v2380_v55 = vmul.f32 %v1417_v35, %v1389_v11  ;;  %v1419_v15 = vadd.f32 %v1418_v8, %v1266_v61  ;;  %v1280_v23 = vadd.f32 %v1279_v45, %v4501_v10 }
 0x1a5   :  { %v1423_v25 = vpop.f32.mrf.mxu1 }
 0x1a6   :  { %v2389_v59 = vadd.f32 %v2380_v55, %v2377_v43  ;;  %v2381_v16 = vmul.f32 %v1419_v15, %v1391_v36  ;;  %v1424_v62 = vadd.f32 %v1423_v25, %v1271_v18 }
 0x1a7   :  { %v1425_v57 = vpop.f32.mrf.mxu1 }
 0x1a8   :  { %v2398_v47 = vadd.f32 %v2381_v16, %v2378_v1  ;;  %v2383_v46 = vmul.f32 %v1424_v62, %v1396_v31  ;;  %v1426_v28 = vadd.f32 %v1425_v57, %v1273_v21 }
 0x1a9   :  { %v1430_v27 = vpop.f32.mrf.mxu1 }
 0x1aa   :  { %v2390_v38 = vadd.f32 %v2389_v59, %v2383_v46  ;;  %v2384_v3 = vmul.f32 %v1426_v28, %v1398_v29  ;;  %v1431_v37 = vadd.f32 %v1430_v27, %v1278_v13 }
 0x1ab   :  { %v1432_v60 = vpop.f32.mrf.mxu1 }
 0x1ac   :  { %v2399_v12 = vadd.f32 %v2398_v47, %v2384_v3  ;;  %v2386_v58 = vmul.f32 %v1431_v37, %v1403_v30  ;;  %v1433_v2 = vadd.f32 %v1432_v60, %v1280_v23 }
 0x1ae   :  { %v2391_v48 = vadd.f32 %v2390_v38, %v2386_v58  ;;  %v2387_v39 = vmul.f32 %v1433_v2, %v1405_v19 }
 0x1b0   :  { %v2392_v54 = vrot.slane %v2391_v48, 4  ;;  %v2400_v22 = vadd.f32 %v2399_v12, %v2387_v39 }
 0x1b2   :  { %v2393_v6 = vadd.f32 %v2392_v54, %v2391_v48  ;;  %v2401_v33 = vrot.slane %v2400_v22, 4 }
 0x1b4   :  { %v2394_v14 = vrot.slane %v2393_v6, 2  ;;  %v2402_v11 = vadd.f32 %v2401_v33, %v2400_v22 }
 0x1b6   :  { %v2395_v7 = vadd.f32 %v2394_v14, %v2393_v6  ;;  %v2403_v56 = vrot.slane %v2402_v11, 2 }
 0x1b8   :  { %v2396_v5 = vrot.slane %v2395_v7, 1  ;;  %v2404_v36 = vadd.f32 %v2403_v56, %v2402_v11 }
 0x1ba   :  { %v2405_v10 = vrot.slane %v2404_v36, 1  ;;  %v4559_v40 = vadd.f32 %v2396_v5, %v2395_v7 }
 0x1bc   :  { %v4561_v49 = vadd.f32 %v2405_v10, %v2404_v36 }
 0x1be   :  { %v2419_v31 = vcombine.low %v4559_v40, %v4561_v49 }
 0x1c5   :  { %v2928_v32 = vpop.f32.mrf.mxu0 }
 0x1c7   :  { %v1522_v17 = vpop.f32.mrf.mxu0 }
 0x1c9   :  { %v2931_v29 = vpop.f32.mrf.mxu0 }
 0x1cb   :  { %v1542_v9 = vpop.f32.mrf.mxu0 }
 0x1cd   :  { %v2972_v53 = vpop.f32.mrf.mxu1  ;;  %v2934_v42 = vpop.f32.mrf.mxu0 }
 0x1ce   :  { %v1750_v60 = vadd.f32 %v2972_v53, %v2928_v32 }
 0x1cf   :  { %v1743_v30 = vpop.f32.mrf.mxu1  ;;  %v1562_v44 = vpop.f32.mrf.mxu0 }
 0x1d0   :  { %v1744_v23 = vadd.f32 %v1743_v30, %v1522_v17 }
 0x1d1   :  { %v2975_v24 = vpop.f32.mrf.mxu1  ;;  %v2937_v51 = vpop.f32.mrf.mxu0 }
 0x1d2   :  { %v1762_v56 = vadd.f32 %v2975_v24, %v2931_v29 }
 0x1d3   :  { %v1755_v19 = vpop.f32.mrf.mxu1  ;;  %v1582_v0 = vpop.f32.mrf.mxu0 }
 0x1d4   :  { %v1756_v48 = vadd.f32 %v1755_v19, %v1542_v9 }
 0x1d5   :  { %v2978_v26 = vpop.f32.mrf.mxu1 }
 0x1d6   :  { %v1774_v38 = vadd.f32 %v2978_v26, %v2934_v42 }
 0x1d7   :  { %v1767_v4 = vpop.f32.mrf.mxu1 }
 0x1d8   :  { %v1768_v3 = vadd.f32 %v1767_v4, %v1562_v44 }
 0x1d9   :  { %v2981_v52 = vpop.f32.mrf.mxu1 }
 0x1da   :  { %v1786_v39 = vadd.f32 %v2981_v52, %v2937_v51 }
 0x1db   :  { %v1779_v43 = vpop.f32.mrf.mxu1 }
 0x1dc   :  { %v1780_v54 = vadd.f32 %v1779_v43, %v1582_v0 }
 0x205   :  { %v3016_v50 = vpop.f32.mrf.mxu0 }
 0x206   :  { %v1897_v33 = vadd.f32 %v3016_v50, %v1750_v60 }
 0x207   :  { %v1889_v41 = vpop.f32.mrf.mxu0 }
 0x208   :  { %v1890_v12 = vadd.f32 %v1889_v41, %v1744_v23 }
 0x209   :  { %v3019_v63 = vpop.f32.mrf.mxu0 }
 0x20a   :  { %v1911_v44 = vadd.f32 %v3019_v63, %v1762_v56 }
 0x20b   :  { %v1903_v61 = vpop.f32.mrf.mxu0 }
 0x20c   :  { %v1904_v5 = vadd.f32 %v1903_v61, %v1756_v48 }
 0x20d   :  { %v3060_v34 = vpop.f32.mrf.mxu1  ;;  %v3022_v35 = vpop.f32.mrf.mxu0 }
 0x20e   :  { %v1925_v58 = vadd.f32 %v3022_v35, %v1774_v38  ;;  %v2036_v30 = vadd.f32 %v3060_v34, %v1897_v33 }
 0x20f   :  { %v2027_v1 = vpop.f32.mrf.mxu1  ;;  %v1917_v8 = vpop.f32.mrf.mxu0 }
 0x210   :  { %v1918_v2 = vadd.f32 %v1917_v8, %v1768_v3  ;;  %v2028_v14 = vadd.f32 %v2027_v1, %v1890_v12 }
 0x211   :  { %v3063_v20 = vpop.f32.mrf.mxu1  ;;  %v3025_v55 = vpop.f32.mrf.mxu0 }
 0x212   :  { %v1939_v36 = vadd.f32 %v3025_v55, %v1786_v39  ;;  %v2052_v43 = vadd.f32 %v3063_v20, %v1911_v44  ;;  %v3182_v20 = vmov 1966171168  }
 0x213   :  { %v2043_v18 = vpop.f32.mrf.mxu1  ;;  %v1931_v25 = vpop.f32.mrf.mxu0 }
 0x214   :  { %v1932_v10 = vadd.f32 %v1931_v25, %v1780_v54  ;;  %v2044_v26 = vadd.f32 %v2043_v18, %v1904_v5 }
 0x215   :  { %v3066_v15 = vpop.f32.mrf.mxu1 }
 0x216   :  { %v2068_v11 = vadd.f32 %v3066_v15, %v1925_v58 }
 0x217   :  { %v2059_v21 = vpop.f32.mrf.mxu1 }
 0x218   :  { %v2060_v7 = vadd.f32 %v2059_v21, %v1918_v2 }
 0x219   :  { %v3069_v16 = vpop.f32.mrf.mxu1 }
 0x21a   :  { %v2084_v9 = vadd.f32 %v3069_v16, %v1939_v36 }
 0x21b   :  { %v2075_v57 = vpop.f32.mrf.mxu1 }
 0x21c   :  { %v2076_v19 = vadd.f32 %v2075_v57, %v1932_v10 }
 0x245   :  { %v3104_v59 = vpop.f32.mrf.mxu0 }
 0x246   :  { %v2209_v4 = vadd.f32 %v3104_v59, %v2036_v30 }
 0x247   :  { %v2202_v62 = vpop.f32.mrf.mxu0 }
 0x248   :  { %v2203_v42 = vadd.f32 %v2202_v62, %v2028_v14 }
 0x249   :  { %v3107_v45 = vpop.f32.mrf.mxu0 }
 0x24a   :  { %v2221_v8 = vadd.f32 %v3107_v45, %v2052_v43 }
 0x24b   :  { %v2214_v13 = vpop.f32.mrf.mxu0 }
 0x24c   :  { %v2215_v29 = vadd.f32 %v2214_v13, %v2044_v26  ;;  %v2421_v13 = vunpack.c.l.s4 %v3182_v20 }
 0x24d   :  { %v3110_v47 = vpop.f32.mrf.mxu0  ;;  %v3148_v46 = vpop.f32.mrf.mxu1 }
 0x24e   :  { %v2233_v32 = vadd.f32 %v3110_v47, %v2068_v11  ;;  %v2338_v61 = vadd.f32 %v3148_v46, %v2209_v4  ;;  %v2422_v38 = vunpack.c.0.s8 %v2421_v13 }
 0x24f   :  { %v2226_v28 = vpop.f32.mrf.mxu0  ;;  %v2331_v27 = vpop.f32.mrf.mxu1 }
 0x250   :  { %v2227_v53 = vadd.f32 %v2226_v28, %v2060_v7  ;;  %v2332_v50 = vadd.f32 %v2331_v27, %v2203_v42  ;;  %v2423_v27 = vlaneseq }
 0x251   :  { %v3151_v37 = vpop.f32.mrf.mxu1  ;;  %v3113_v22 = vpop.f32.mrf.mxu0 }
 0x252   :  { %v2245_v1 = vadd.f32 %v3113_v22, %v2084_v9  ;;  %v2350_v21 = vadd.f32 %v3151_v37, %v2221_v8  ;;  %v2424_v3 = vshrl.u32 %v2423_v27, 7  ;;  %vm2445_vm1 = vcmp.lt.s32.totalorder %v2423_v27, 384 }
 0x253   :  { %v2343_v6 = vpop.f32.mrf.mxu1  ;;  %v2238_v51 = vpop.f32.mrf.mxu0 }
 0x254   :  { %v2239_v35 = vadd.f32 %v2238_v51, %v2076_v19  ;;  %v2344_v15 = vadd.f32 %v2343_v6, %v2215_v29  ;;  %v2425_v12 = vsub.s32 %v2422_v38, %v2424_v3 }
 0x255   :  { %v3154_v17 = vpop.f32.mrf.mxu1 }
 0x256   :  { %v2362_v52 = vadd.f32 %v3154_v17, %v2233_v32  ;;  %v2426_v37 = vrot.slane %v2419_v31, %v2425_v12 }
 0x257   :  { %v2355_v0 = vpop.f32.mrf.mxu1 }
 0x258   :  { %v2356_v41 = vadd.f32 %v2355_v0, %v2227_v53  ;;  %v2382_v63 = vmul.f32 %v2362_v52, %v2338_v61 }
 0x259   :  { %v3157_v24 = vpop.f32.mrf.mxu1 }
 0x25a   :  { %v2379_v34 = vmul.f32 %v2356_v41, %v2332_v50  ;;  %v2374_v18 = vadd.f32 %v3157_v24, %v2245_v1 }
 0x25b   :  { %v2367_v55 = vpop.f32.mrf.mxu1 }
 0x25c   :  { %v2368_v25 = vadd.f32 %v2367_v55, %v2239_v35  ;;  %v2407_v16 = vadd.f32 %v2382_v63, %v2379_v34  ;;  %v2388_v59 = vmul.f32 %v2374_v18, %v2350_v21 }
 0x25e   :  { %v2385_v62 = vmul.f32 %v2368_v25, %v2344_v15 }
 0x260   :  { %v2408_v57 = vadd.f32 %v2407_v16, %v2385_v62 }
 0x262   :  { %v2409_v47 = vadd.f32 %v2408_v57, %v2388_v59 }
 0x264   :  { %v2410_v28 = vrot.slane %v2409_v47, 4 }
 0x266   :  { %v2411_v46 = vadd.f32 %v2410_v28, %v2409_v47 }
 0x268   :  { %v2412_v23 = vrot.slane %v2411_v46, 2 }
 0x26a   :  { %v2413_v45 = vadd.f32 %v2412_v23, %v2411_v46 }
 0x26c   :  { %v2414_v60 = vrot.slane %v2413_v45, 1 }
 0x26e   :  { %v2415_v58 = vadd.f32 %v2414_v60, %v2413_v45 }
 0x270   :  { %v2433_v2 = vrot.slane %v2415_v58, %v2425_v12 }
 0x272   :  { %v2434_v48 = vcombine.low %v2426_v37, %v2433_v2 }
 0x274   :  { %v2441_v39 = vrot.slane %v2434_v48, %v2425_v12 }
 0x276   :  { %2447 = vst.msk [vmem:[#allocation2] sm:$0x7] %vm2445_vm1, %v2441_v39 }
 0x277   :  { %3171 = shalt.err (!%p3168_p4)
}
 0x278   :  { %2457 = dma.vmem_to_hbm [thread:$0]  %s2455_s7, 48, %s4573_s2, [#allocation3]  }
 0x279   :  { %3180 = dma.done.wait [#allocation3], 48  }
 0x27a   :  { %3181 = vsyncadd [#allocation3], 4294967248 }
 0x27b   :  { %2461 = vsyncpa [#allocation3], 1 }

</bundles_post_ra>
